<compile_context>
chip_gen: v5e
topology: v5e:2x2
jax: 0.10.0
libtpu: 0.0.40
codegen_flags: <defaults>
</compile_context>

<pallas_src>
import functools

import jax
import jax.numpy as jnp
from jax import lax
from jax.experimental import pallas as pl
from jax.experimental.pallas import tpu as pltpu


# ----------------------------------------------------------------------------
# Fused patch-embed + CLS/pos-embed assembly kernel (one grid step per batch)
# ----------------------------------------------------------------------------

def _embed_kernel(p_ref, w_ref, b_ref, pos_ref, suf_ref, o_ref):
    np_ = pos_ref.shape[0]                       # number of patch tokens
    emb = jnp.dot(p_ref[0], w_ref[...], preferred_element_type=jnp.float32)
    emb = emb + b_ref[...] + pos_ref[...]        # bias + positional embedding
    o_ref[0, 0:np_, :] = emb                     # patch tokens
    o_ref[0, np_:, :] = suf_ref[...]             # CLS(+pos) row followed by zero padding


def embed_assemble(patches, patch_w, patch_b, pos_patch, suffix, *, n_pad):
    """patches:(B,Np,Kp) bf16 -> token slab (B, n_pad, D) f32."""
    B, Np, Kp = patches.shape
    D = patch_w.shape[1]
    return pl.pallas_call(
        _embed_kernel,
        out_shape=jax.ShapeDtypeStruct((B, n_pad, D), jnp.float32),
        grid=(B,),
        in_specs=[
            pl.BlockSpec((1, Np, Kp), lambda b: (b, 0, 0)),
            pl.BlockSpec((Kp, D), lambda b: (0, 0)),
            pl.BlockSpec((1, D), lambda b: (0, 0)),
            pl.BlockSpec((Np, D), lambda b: (0, 0)),
            pl.BlockSpec((n_pad - Np, D), lambda b: (0, 0)),
        ],
        out_specs=pl.BlockSpec((1, n_pad, D), lambda b: (b, 0, 0)),
        compiler_params=pltpu.CompilerParams(
            dimension_semantics=("parallel",)),
    )(patches, patch_w, patch_b, pos_patch, suffix)


# ----------------------------------------------------------------------------
# Fully fused transformer block kernel (one grid step per batch)
#   LN1 -> QKV -> MHSA -> proj -> LS residual -> LN2 -> FC1 -> GELU -> FC2 ->
#   LS residual, all VMEM-resident.
# ----------------------------------------------------------------------------

def _block_kernel(x_ref, ln1_g_ref, ln1_b_ref, qkv_w_ref, qkv_b_ref,
                  proj_w_ref, proj_b_ref, ls1_ref,
                  ln2_g_ref, ln2_b_ref, fc1_w_ref, fc1_b_ref,
                  fc2_w_ref, fc2_b_ref, ls2_ref,
                  o_ref, attn_sc, *, nh, dh, n_valid, eps):
    x = x_ref[0]                                 # (T, D) f32 residual slab
    T = x.shape[0]

    # ---- LN1 -> QKV (scale already folded into q columns of qkv_w/qkv_b) ----
    mu = jnp.mean(x, axis=-1, keepdims=True)
    var = jnp.mean(jnp.square(x - mu), axis=-1, keepdims=True)
    xn = (x - mu) * lax.rsqrt(var + eps) * ln1_g_ref[...] + ln1_b_ref[...]
    qkv = jnp.dot(xn.astype(jnp.bfloat16), qkv_w_ref[...],
                  preferred_element_type=jnp.float32) + qkv_b_ref[...]
    qkv = qkv.astype(jnp.bfloat16)               # (T, 3D) head-major layout

    key_mask = lax.broadcasted_iota(jnp.int32, (T, T), 1) < n_valid

    # TODO(synk): for production head counts (nh=12-16) bound live ranges with
    # lax.fori_loop / a grid axis and query-tile (flash-style) for long Np.
    for h in range(nh):
        base = 3 * dh * h
        q = qkv[:, base:base + dh]
        k = qkv[:, base + dh:base + 2 * dh]
        v = qkv[:, base + 2 * dh:base + 3 * dh]
        s = lax.dot_general(q, k, (((1,), (1,)), ((), ())),
                            preferred_element_type=jnp.float32)     # (T, T)
        s = jnp.where(key_mask, s, jnp.float32(-1e30))
        m = jnp.max(s, axis=-1, keepdims=True)
        p = jnp.exp(s - m)
        p = p * pl.reciprocal(jnp.sum(p, axis=-1, keepdims=True), approx=True)
        o_h = jnp.dot(p.astype(jnp.bfloat16), v,
                      preferred_element_type=jnp.float32)           # (T, dh)
        attn_sc[:, h * dh:(h + 1) * dh] = o_h.astype(jnp.bfloat16)

    # Single full-K output projection from the VMEM scratch (no per-head K=64).
    y = jnp.dot(attn_sc[...], proj_w_ref[...],
                preferred_element_type=jnp.float32) + proj_b_ref[...]
    x1 = x + y * ls1_ref[...]                    # LayerScale residual (f32)

    # ---- LN2 -> FC1 -> GELU -> FC2 -> LayerScale residual ----
    mu2 = jnp.mean(x1, axis=-1, keepdims=True)
    var2 = jnp.mean(jnp.square(x1 - mu2), axis=-1, keepdims=True)
    xn2 = (x1 - mu2) * lax.rsqrt(var2 + eps) * ln2_g_ref[...] + ln2_b_ref[...]
    hdn = jnp.dot(xn2.astype(jnp.bfloat16), fc1_w_ref[...],
                  preferred_element_type=jnp.float32) + fc1_b_ref[...]
    # TODO(synk): PyTorch nn.GELU default is the exact erf form; tanh
    # approximation is used here for robust Mosaic lowering.
    hdn = jax.nn.gelu(hdn, approximate=True)
    y2 = jnp.dot(hdn.astype(jnp.bfloat16), fc2_w_ref[...],
                 preferred_element_type=jnp.float32) + fc2_b_ref[...]
    o_ref[0] = x1 + y2 * ls2_ref[...]


def transformer_block(x, blk, *, nh, dh, n_valid, eps=1e-6):
    """x:(B,T,D) f32 -> (B,T,D) f32, one fused pallas_call per block."""
    B, T, D = x.shape
    Hd = blk["fc1_w"].shape[1]
    full = lambda b: (0, 0)
    kernel = functools.partial(_block_kernel, nh=nh, dh=dh,
                               n_valid=n_valid, eps=eps)
    return pl.pallas_call(
        kernel,
        out_shape=jax.ShapeDtypeStruct((B, T, D), jnp.float32),
        grid=(B,),
        in_specs=[
            pl.BlockSpec((1, T, D), lambda b: (b, 0, 0)),   # residual slab
            pl.BlockSpec((1, D), full),                     # ln1_g
            pl.BlockSpec((1, D), full),                     # ln1_b
            pl.BlockSpec((D, 3 * D), full),                 # qkv_w (head-major, scaled)
            pl.BlockSpec((1, 3 * D), full),                 # qkv_b
            pl.BlockSpec((D, D), full),                     # proj_w
            pl.BlockSpec((1, D), full),                     # proj_b
            pl.BlockSpec((1, D), full),                     # ls1
            pl.BlockSpec((1, D), full),                     # ln2_g
            pl.BlockSpec((1, D), full),                     # ln2_b
            pl.BlockSpec((D, Hd), full),                    # fc1_w
            pl.BlockSpec((1, Hd), full),                    # fc1_b
            pl.BlockSpec((Hd, D), full),                    # fc2_w
            pl.BlockSpec((1, D), full),                     # fc2_b
            pl.BlockSpec((1, D), full),                     # ls2
        ],
        out_specs=pl.BlockSpec((1, T, D), lambda b: (b, 0, 0)),
        scratch_shapes=[pltpu.VMEM((T, D), jnp.bfloat16)],  # per-head attn concat
        compiler_params=pltpu.CompilerParams(
            dimension_semantics=("parallel",)),
    )(x, blk["ln1_g"], blk["ln1_b"], blk["qkv_w"], blk["qkv_b"],
      blk["proj_w"], blk["proj_b"], blk["ls1_g"],
      blk["ln2_g"], blk["ln2_b"], blk["fc1_w"], blk["fc1_b"],
      blk["fc2_w"], blk["fc2_b"], blk["ls2_g"])


# ----------------------------------------------------------------------------
# Final LayerNorm on the CLS rows (tiny; whole-array block)
# ----------------------------------------------------------------------------

def _layernorm_kernel(x_ref, g_ref, b_ref, o_ref, *, eps):
    x = x_ref[...].astype(jnp.float32)
    mu = jnp.mean(x, axis=-1, keepdims=True)
    var = jnp.mean(jnp.square(x - mu), axis=-1, keepdims=True)
    o_ref[...] = (x - mu) * lax.rsqrt(var + eps) * g_ref[...] + b_ref[...]


def layernorm(x, g, b, *, eps=1e-6):
    M, D = x.shape
    return pl.pallas_call(
        functools.partial(_layernorm_kernel, eps=eps),
        out_shape=jax.ShapeDtypeStruct((M, D), jnp.float32),
    )(x, g, b)


# ----------------------------------------------------------------------------
# Parameter init (deterministic, synthetic — no .pt/.pth loading)
# ----------------------------------------------------------------------------

def init_params(key, *, img_size=16, patch_size=4, in_chans=3,
                embed_dim=128, depth=2, num_heads=2, mlp_ratio=4):
    hidden = embed_dim * mlp_ratio
    n_patches = (img_size // patch_size) ** 2
    keys = jax.random.split(key, 4 + depth)

    def dense(k, shape, std=0.02, dtype=jnp.bfloat16):
        return (std * jax.random.normal(k, shape, dtype=jnp.float32)).astype(dtype)

    params = {
        "patch_size": patch_size,
        "embed_dim": embed_dim,
        "num_heads": num_heads,
        # conv(D, C, ps, ps) flattened to a (C*ps*ps, D) matmul weight
        "patch_w": dense(keys[0], (in_chans * patch_size * patch_size, embed_dim)),
        "patch_b": jnp.zeros((1, embed_dim), jnp.float32),
        "cls_token": dense(keys[1], (1, 1, embed_dim), dtype=jnp.float32),
        "pos_embed": dense(keys[2], (1, n_patches + 1, embed_dim), dtype=jnp.float32),
        "norm_g": jnp.ones((1, embed_dim), jnp.float32),
        "norm_b": jnp.zeros((1, embed_dim), jnp.float32),
        "blocks": [],
    }
    for d in range(depth):
        bk = jax.random.split(keys[4 + d], 4)
        params["blocks"].append({
            "ln1_g": jnp.ones((1, embed_dim), jnp.float32),
            "ln1_b": jnp.zeros((1, embed_dim), jnp.float32),
            "qkv_w": dense(bk[0], (embed_dim, 3 * embed_dim)),
            "qkv_b": jnp.zeros((1, 3 * embed_dim), jnp.float32),
            "proj_w": dense(bk[1], (embed_dim, embed_dim)),
            "proj_b": jnp.zeros((1, embed_dim), jnp.float32),
            "ls1_g": jnp.full((1, embed_dim), 1e-1, jnp.float32),
            "ln2_g": jnp.ones((1, embed_dim), jnp.float32),
            "ln2_b": jnp.zeros((1, embed_dim), jnp.float32),
            "fc1_w": dense(bk[2], (embed_dim, hidden)),
            "fc1_b": jnp.zeros((1, hidden), jnp.float32),
            "fc2_w": dense(bk[3], (hidden, embed_dim)),
            "fc2_b": jnp.zeros((1, embed_dim), jnp.float32),
            "ls2_g": jnp.full((1, embed_dim), 1e-1, jnp.float32),
        })
    return params


# ----------------------------------------------------------------------------
# One-time host-side weight preparation:
#   * fold softmax scale into Q columns of qkv_w / qkv_b
#   * permute QKV columns to head-major layout (q0|k0|v0|q1|k1|v1|...)
#   * zero-pad the im2col K dimension of patch_w to a multiple of 128
#   * pre-build the "suffix" slab (CLS+pos row followed by zero padding)
# ----------------------------------------------------------------------------

def prepare_params(params):
    D = params["embed_dim"]
    nh = params["num_heads"]
    dh = D // nh
    scale = dh ** -0.5

    N = params["pos_embed"].shape[1]          # patches + CLS
    Np = N - 1
    n_pad = ((N + 15) // 16) * 16
    K = params["patch_w"].shape[0]
    k_pad = ((K + 127) // 128) * 128

    patch_w = jnp.pad(params["patch_w"], ((0, k_pad - K), (0, 0)))
    pos_patch = params["pos_embed"][0, 1:N, :]                       # (Np, D)
    cls_row = params["cls_token"][0, 0, :] + params["pos_embed"][0, 0, :]
    suffix = jnp.zeros((n_pad - Np, D), jnp.float32).at[0].set(cls_row)

    # head-major permutation of QKV columns
    perm = []
    for h in range(nh):
        perm += list(range(h * dh, (h + 1) * dh))                    # Q_h
        perm += list(range(D + h * dh, D + (h + 1) * dh))            # K_h
        perm += list(range(2 * D + h * dh, 2 * D + (h + 1) * dh))    # V_h
    perm = jnp.array(perm, jnp.int32)

    blocks = []
    for blk in params["blocks"]:
        qw = blk["qkv_w"].astype(jnp.float32)
        qb = blk["qkv_b"].astype(jnp.float32)
        qw = qw.at[:, :D].multiply(scale)        # fold softmax scale into Q
        qb = qb.at[:, :D].multiply(scale)
        nblk = dict(blk)
        nblk["qkv_w"] = qw[:, perm].astype(jnp.bfloat16)
        nblk["qkv_b"] = qb[:, perm]
        blocks.append(nblk)

    return {
        "patch_size": params["patch_size"],
        "embed_dim": D,
        "num_heads": nh,
        "n_pad": n_pad,
        "k_pad": k_pad,
        "n_valid": N,
        "patch_w": patch_w,
        "patch_b": params["patch_b"],
        "pos_patch": pos_patch,
        "suffix": suffix,
        "norm_g": params["norm_g"],
        "norm_b": params["norm_b"],
        "blocks": blocks,
    }


# ----------------------------------------------------------------------------
# Forward pass (mirrors DINOv2 ViT forward; hub head is Identity -> CLS token)
# ----------------------------------------------------------------------------

def dino_v2_forward(x, prep):
    B, C, H, W = x.shape
    ps = prep["patch_size"]
    D = prep["embed_dim"]
    nh = prep["num_heads"]
    dh = D // nh
    Hp, Wp = H // ps, W // ps
    Np = Hp * Wp
    K = C * ps * ps
    n_pad, k_pad = prep["n_pad"], prep["k_pad"]

    # --- host im2col glue: patch features in (c, kh, kw) order (PyTorch conv) ---
    patches = (x.reshape(B, C, Hp, ps, Wp, ps)
                 .transpose(0, 2, 4, 1, 3, 5)
                 .reshape(B, Np, K))
    patches = jnp.pad(patches, ((0, 0), (0, 0), (0, k_pad - K))).astype(jnp.bfloat16)

    # --- fused patch embed + bias + pos-embed + CLS insertion + padding ---
    # Token order: rows 0..Np-1 = patch tokens, row Np = CLS, rest = padding.
    tok = embed_assemble(patches, prep["patch_w"], prep["patch_b"],
                         prep["pos_patch"], prep["suffix"], n_pad=n_pad)

    # --- transformer blocks: one fused pallas_call per block ---
    for blk in prep["blocks"]:
        tok = transformer_block(tok, blk, nh=nh, dh=dh, n_valid=prep["n_valid"])

    # --- final LayerNorm on the CLS rows only (hub head = Identity) ---
    cls_tok = tok[:, Np, :]                     # (B, D)
    return layernorm(cls_tok, prep["norm_g"], prep["norm_b"])


# ----------------------------------------------------------------------------
# Demo
# ----------------------------------------------------------------------------

if __name__ == "__main__":
    key = jax.random.PRNGKey(0)
    kp, kx = jax.random.split(key)

    # Scaled-down ViT config consistent with DINOv2 forward semantics.
    B, C, H, W = 2, 3, 16, 16
    D = 128
    params = init_params(kp, img_size=H, patch_size=4, in_chans=C,
                         embed_dim=D, depth=2, num_heads=2, mlp_ratio=4)
    prep = prepare_params(params)

    x = jax.random.normal(kx, (B, C, H, W), dtype=jnp.float32)  # NCHW like PyTorch

    fwd = jax.jit(lambda inp: dino_v2_forward(inp, prep))
    out = fwd(x)
    jax.block_until_ready(out)

    assert out.shape == (B, D), out.shape
    assert out.dtype == jnp.float32
    assert bool(jnp.all(jnp.isfinite(out)))
    print("KERNEL_OK")
</pallas_src>

<mosaic_0001>
module attributes {stable_mosaic.version = 11 : i64} {
  func.func @_embed_kernel(%arg0: i32, %arg1: memref<1x16x128xbf16, #tpu.memory_space<vmem>>, %arg2: memref<128x128xbf16, #tpu.memory_space<vmem>>, %arg3: memref<1x128xf32, #tpu.memory_space<vmem>>, %arg4: memref<16x128xf32, #tpu.memory_space<vmem>>, %arg5: memref<16x128xf32, #tpu.memory_space<vmem>>, %arg6: memref<1x32x128xf32, #tpu.memory_space<vmem>>) attributes {dimension_semantics = [#tpu.dimension_semantics<parallel>], iteration_bounds = array<i64: 2>, scalar_prefetch = 0 : i64, scratch_operands = 0 : i64, tpu.core_type = #tpu.core_type<tc>, window_params = [{transform_indices = @transform_0, window_bounds = array<i64: 1, 16, 128>}, {pipeline_mode = #tpu.pipeline_mode<synchronous>, transform_indices = @transform_1, window_bounds = array<i64: 128, 128>}, {pipeline_mode = #tpu.pipeline_mode<synchronous>, transform_indices = @transform_2, window_bounds = array<i64: 1, 128>}, {pipeline_mode = #tpu.pipeline_mode<synchronous>, transform_indices = @transform_3, window_bounds = array<i64: 16, 128>}, {pipeline_mode = #tpu.pipeline_mode<synchronous>, transform_indices = @transform_4, window_bounds = array<i64: 16, 128>}, {transform_indices = @transform_5, window_bounds = array<i64: 1, 32, 128>}]} {
    %c0 = arith.constant 0 : index
    %c0_0 = arith.constant 0 : index
    %c0_1 = arith.constant 0 : index
    %0 = vector.load %arg1[%c0, %c0_0, %c0_1] : memref<1x16x128xbf16, #tpu.memory_space<vmem>>, vector<1x16x128xbf16>
    %1 = vector.shape_cast %0 : vector<1x16x128xbf16> to vector<16x128xbf16>
    %c0_2 = arith.constant 0 : index
    %c0_3 = arith.constant 0 : index
    %2 = vector.load %arg2[%c0_2, %c0_3] : memref<128x128xbf16, #tpu.memory_space<vmem>>, vector<128x128xbf16>
    %cst = arith.constant dense<0.000000e+00> : vector<16x128xf32>
    %3 = tpu.matmul %1, %2, %cst {dimension_numbers = #tpu.dot_dimension_numbers<[1], [0], [0], [1], [0, 0, 1, 1], [], []>} : vector<16x128xbf16>, vector<128x128xbf16>, vector<16x128xf32> -> vector<16x128xf32>
    %c0_4 = arith.constant 0 : index
    %c0_5 = arith.constant 0 : index
    %4 = vector.load %arg3[%c0_4, %c0_5] : memref<1x128xf32, #tpu.memory_space<vmem>>, vector<1x128xf32>
    %5 = vector.broadcast %4 : vector<1x128xf32> to vector<16x128xf32>
    %6 = arith.addf %3, %5 : vector<16x128xf32>
    %c0_6 = arith.constant 0 : index
    %c0_7 = arith.constant 0 : index
    %7 = vector.load %arg4[%c0_6, %c0_7] : memref<16x128xf32, #tpu.memory_space<vmem>>, vector<16x128xf32>
    %8 = arith.addf %6, %7 : vector<16x128xf32>
    %c0_8 = arith.constant 0 : index
    %c0_9 = arith.constant 0 : index
    %c0_10 = arith.constant 0 : index
    %9 = vector.load %arg6[%c0_8, %c0_9, %c0_10] : memref<1x32x128xf32, #tpu.memory_space<vmem>>, vector<1x16x128xf32>
    %10 = vector.shape_cast %9 : vector<1x16x128xf32> to vector<16x128xf32>
    %11 = vector.shape_cast %8 : vector<16x128xf32> to vector<1x16x128xf32>
    tpu.vector_store %arg6[%c0_8, %c0_9, %c0_10], %11 {strides = array<i32>} : memref<1x32x128xf32, #tpu.memory_space<vmem>>, vector<1x16x128xf32>,
    %c0_11 = arith.constant 0 : index
    %c0_12 = arith.constant 0 : index
    %12 = vector.load %arg5[%c0_11, %c0_12] : memref<16x128xf32, #tpu.memory_space<vmem>>, vector<16x128xf32>
    %c0_13 = arith.constant 0 : index
    %c16 = arith.constant 16 : index
    %c0_14 = arith.constant 0 : index
    %13 = vector.load %arg6[%c0_13, %c16, %c0_14] : memref<1x32x128xf32, #tpu.memory_space<vmem>>, vector<1x16x128xf32>
    %14 = vector.shape_cast %13 : vector<1x16x128xf32> to vector<16x128xf32>
    %15 = vector.shape_cast %12 : vector<16x128xf32> to vector<1x16x128xf32>
    tpu.vector_store %arg6[%c0_13, %c16, %c0_14], %15 {strides = array<i32>} : memref<1x32x128xf32, #tpu.memory_space<vmem>>, vector<1x16x128xf32>,
    return
  }
  func.func @transform_0(%arg0: i32) -> (i32, i32, i32) {
    %c0_i32 = arith.constant 0 : i32
    %c0_i32_0 = arith.constant 0 : i32
    %c0_i32_1 = arith.constant 0 : i32
    return %arg0, %c0_i32, %c0_i32_0 : i32, i32, i32
  }
  func.func @transform_1(%arg0: i32) -> (i32, i32) {
    %c0_i32 = arith.constant 0 : i32
    %c0_i32_0 = arith.constant 0 : i32
    %c0_i32_1 = arith.constant 0 : i32
    return %c0_i32, %c0_i32_0 : i32, i32
  }
  func.func @transform_2(%arg0: i32) -> (i32, i32) {
    %c0_i32 = arith.constant 0 : i32
    %c0_i32_0 = arith.constant 0 : i32
    %c0_i32_1 = arith.constant 0 : i32
    return %c0_i32, %c0_i32_0 : i32, i32
  }
  func.func @transform_3(%arg0: i32) -> (i32, i32) {
    %c0_i32 = arith.constant 0 : i32
    %c0_i32_0 = arith.constant 0 : i32
    %c0_i32_1 = arith.constant 0 : i32
    return %c0_i32, %c0_i32_0 : i32, i32
  }
  func.func @transform_4(%arg0: i32) -> (i32, i32) {
    %c0_i32 = arith.constant 0 : i32
    %c0_i32_0 = arith.constant 0 : i32
    %c0_i32_1 = arith.constant 0 : i32
    return %c0_i32, %c0_i32_0 : i32, i32
  }
  func.func @transform_5(%arg0: i32) -> (i32, i32, i32) {
    %c0_i32 = arith.constant 0 : i32
    %c0_i32_0 = arith.constant 0 : i32
    %c0_i32_1 = arith.constant 0 : i32
    return %arg0, %c0_i32, %c0_i32_0 : i32, i32, i32
  }
}

module attributes {stable_mosaic.version = 11 : i64} {
  func.func @_layernorm_kernel(%arg0: memref<2x128xf32, #tpu.memory_space<vmem>>, %arg1: memref<1x128xf32, #tpu.memory_space<vmem>>, %arg2: memref<1x128xf32, #tpu.memory_space<vmem>>, %arg3: memref<2x128xf32, #tpu.memory_space<vmem>>) attributes {dimension_semantics = [], scalar_prefetch = 0 : i64, scratch_operands = 0 : i64, tpu.core_type = #tpu.core_type<tc>} {
    %c0 = arith.constant 0 : index
    %c0_0 = arith.constant 0 : index
    %0 = vector.load %arg0[%c0, %c0_0] : memref<2x128xf32, #tpu.memory_space<vmem>>, vector<2x128xf32>
    %cst = arith.constant dense<0.000000e+00> : vector<2xf32>
    %1 = vector.multi_reduction <add>, %0, %cst [1] : vector<2x128xf32> to vector<2xf32>
    %2 = vector.shape_cast %1 : vector<2xf32> to vector<2x1xf32>
    %cst_1 = arith.constant 1.280000e+02 : f32
    %3 = vector.broadcast %cst_1 : f32 to vector<2x1xf32>
    %4 = arith.divf %2, %3 : vector<2x1xf32>
    %5 = vector.broadcast %4 : vector<2x1xf32> to vector<2x128xf32>
    %6 = arith.subf %0, %5 : vector<2x128xf32>
    %7 = arith.mulf %6, %6 : vector<2x128xf32>
    %cst_2 = arith.constant dense<0.000000e+00> : vector<2xf32>
    %8 = vector.multi_reduction <add>, %7, %cst_2 [1] : vector<2x128xf32> to vector<2xf32>
    %9 = vector.shape_cast %8 : vector<2xf32> to vector<2x1xf32>
    %cst_3 = arith.constant 1.280000e+02 : f32
    %10 = vector.broadcast %cst_3 : f32 to vector<2x1xf32>
    %11 = arith.divf %9, %10 : vector<2x1xf32>
    %12 = vector.broadcast %4 : vector<2x1xf32> to vector<2x128xf32>
    %13 = arith.subf %0, %12 : vector<2x128xf32>
    %cst_4 = arith.constant 9.99999997E-7 : f32
    %14 = vector.broadcast %cst_4 : f32 to vector<2x1xf32>
    %15 = arith.addf %11, %14 : vector<2x1xf32>
    %16 = math.rsqrt %15 : vector<2x1xf32>
    %17 = vector.broadcast %16 : vector<2x1xf32> to vector<2x128xf32>
    %18 = arith.mulf %13, %17 : vector<2x128xf32>
    %c0_5 = arith.constant 0 : index
    %c0_6 = arith.constant 0 : index
    %19 = vector.load %arg1[%c0_5, %c0_6] : memref<1x128xf32, #tpu.memory_space<vmem>>, vector<1x128xf32>
    %20 = vector.broadcast %19 : vector<1x128xf32> to vector<2x128xf32>
    %21 = arith.mulf %18, %20 : vector<2x128xf32>
    %c0_7 = arith.constant 0 : index
    %c0_8 = arith.constant 0 : index
    %22 = vector.load %arg2[%c0_7, %c0_8] : memref<1x128xf32, #tpu.memory_space<vmem>>, vector<1x128xf32>
    %23 = vector.broadcast %22 : vector<1x128xf32> to vector<2x128xf32>
    %24 = arith.addf %21, %23 : vector<2x128xf32>
    %c0_9 = arith.constant 0 : index
    %c0_10 = arith.constant 0 : index
    %25 = vector.load %arg3[%c0_9, %c0_10] : memref<2x128xf32, #tpu.memory_space<vmem>>, vector<2x128xf32>
    tpu.vector_store %arg3[%c0_9, %c0_10], %24 {strides = array<i32>} : memref<2x128xf32, #tpu.memory_space<vmem>>, vector<2x128xf32>,
    return
  }
}

module attributes {stable_mosaic.version = 11 : i64} {
  func.func @_block_kernel(%arg0: i32, %arg1: memref<1x32x128xf32, #tpu.memory_space<vmem>>, %arg2: memref<1x128xf32, #tpu.memory_space<vmem>>, %arg3: memref<1x128xf32, #tpu.memory_space<vmem>>, %arg4: memref<128x384xbf16, #tpu.memory_space<vmem>>, %arg5: memref<1x384xf32, #tpu.memory_space<vmem>>, %arg6: memref<128x128xbf16, #tpu.memory_space<vmem>>, %arg7: memref<1x128xf32, #tpu.memory_space<vmem>>, %arg8: memref<1x128xf32, #tpu.memory_space<vmem>>, %arg9: memref<1x128xf32, #tpu.memory_space<vmem>>, %arg10: memref<1x128xf32, #tpu.memory_space<vmem>>, %arg11: memref<128x512xbf16, #tpu.memory_space<vmem>>, %arg12: memref<1x512xf32, #tpu.memory_space<vmem>>, %arg13: memref<512x128xbf16, #tpu.memory_space<vmem>>, %arg14: memref<1x128xf32, #tpu.memory_space<vmem>>, %arg15: memref<1x128xf32, #tpu.memory_space<vmem>>, %arg16: memref<1x32x128xf32, #tpu.memory_space<vmem>>, %arg17: memref<32x128xbf16, #tpu.memory_space<vmem>>) attributes {dimension_semantics = [#tpu.dimension_semantics<parallel>], iteration_bounds = array<i64: 2>, scalar_prefetch = 0 : i64, scratch_operands = 1 : i64, tpu.core_type = #tpu.core_type<tc>, window_params = [{transform_indices = @transform_0, window_bounds = array<i64: 1, 32, 128>}, {pipeline_mode = #tpu.pipeline_mode<synchronous>, transform_indices = @transform_1, window_bounds = array<i64: 1, 128>}, {pipeline_mode = #tpu.pipeline_mode<synchronous>, transform_indices = @transform_2, window_bounds = array<i64: 1, 128>}, {pipeline_mode = #tpu.pipeline_mode<synchronous>, transform_indices = @transform_3, window_bounds = array<i64: 128, 384>}, {pipeline_mode = #tpu.pipeline_mode<synchronous>, transform_indices = @transform_4, window_bounds = array<i64: 1, 384>}, {pipeline_mode = #tpu.pipeline_mode<synchronous>, transform_indices = @transform_5, window_bounds = array<i64: 128, 128>}, {pipeline_mode = #tpu.pipeline_mode<synchronous>, transform_indices = @transform_6, window_bounds = array<i64: 1, 128>}, {pipeline_mode = #tpu.pipeline_mode<synchronous>, transform_indices = @transform_7, window_bounds = array<i64: 1, 128>}, {pipeline_mode = #tpu.pipeline_mode<synchronous>, transform_indices = @transform_8, window_bounds = array<i64: 1, 128>}, {pipeline_mode = #tpu.pipeline_mode<synchronous>, transform_indices = @transform_9, window_bounds = array<i64: 1, 128>}, {pipeline_mode = #tpu.pipeline_mode<synchronous>, transform_indices = @transform_10, window_bounds = array<i64: 128, 512>}, {pipeline_mode = #tpu.pipeline_mode<synchronous>, transform_indices = @transform_11, window_bounds = array<i64: 1, 512>}, {pipeline_mode = #tpu.pipeline_mode<synchronous>, transform_indices = @transform_12, window_bounds = array<i64: 512, 128>}, {pipeline_mode = #tpu.pipeline_mode<synchronous>, transform_indices = @transform_13, window_bounds = array<i64: 1, 128>}, {pipeline_mode = #tpu.pipeline_mode<synchronous>, transform_indices = @transform_14, window_bounds = array<i64: 1, 128>}, {transform_indices = @transform_15, window_bounds = array<i64: 1, 32, 128>}]} {
    %c0 = arith.constant 0 : index
    %c0_0 = arith.constant 0 : index
    %c0_1 = arith.constant 0 : index
    %0 = vector.load %arg1[%c0, %c0_0, %c0_1] : memref<1x32x128xf32, #tpu.memory_space<vmem>>, vector<1x32x128xf32>
    %1 = vector.shape_cast %0 : vector<1x32x128xf32> to vector<32x128xf32>
    %cst = arith.constant dense<0.000000e+00> : vector<32xf32>
    %2 = vector.multi_reduction <add>, %1, %cst [1] : vector<32x128xf32> to vector<32xf32>
    %3 = vector.shape_cast %2 : vector<32xf32> to vector<32x1xf32>
    %cst_2 = arith.constant 1.280000e+02 : f32
    %4 = vector.broadcast %cst_2 : f32 to vector<32x1xf32>
    %5 = arith.divf %3, %4 : vector<32x1xf32>
    %6 = vector.broadcast %5 : vector<32x1xf32> to vector<32x128xf32>
    %7 = arith.subf %1, %6 : vector<32x128xf32>
    %8 = arith.mulf %7, %7 : vector<32x128xf32>
    %cst_3 = arith.constant dense<0.000000e+00> : vector<32xf32>
    %9 = vector.multi_reduction <add>, %8, %cst_3 [1] : vector<32x128xf32> to vector<32xf32>
    %10 = vector.shape_cast %9 : vector<32xf32> to vector<32x1xf32>
    %cst_4 = arith.constant 1.280000e+02 : f32
    %11 = vector.broadcast %cst_4 : f32 to vector<32x1xf32>
    %12 = arith.divf %10, %11 : vector<32x1xf32>
    %13 = vector.broadcast %5 : vector<32x1xf32> to vector<32x128xf32>
    %14 = arith.subf %1, %13 : vector<32x128xf32>
    %cst_5 = arith.constant 9.99999997E-7 : f32
    %15 = vector.broadcast %cst_5 : f32 to vector<32x1xf32>
    %16 = arith.addf %12, %15 : vector<32x1xf32>
    %17 = math.rsqrt %16 : vector<32x1xf32>
    %18 = vector.broadcast %17 : vector<32x1xf32> to vector<32x128xf32>
    %19 = arith.mulf %14, %18 : vector<32x128xf32>
    %c0_6 = arith.constant 0 : index
    %c0_7 = arith.constant 0 : index
    %20 = vector.load %arg2[%c0_6, %c0_7] : memref<1x128xf32, #tpu.memory_space<vmem>>, vector<1x128xf32>
    %21 = vector.broadcast %20 : vector<1x128xf32> to vector<32x128xf32>
    %22 = arith.mulf %19, %21 : vector<32x128xf32>
    %c0_8 = arith.constant 0 : index
    %c0_9 = arith.constant 0 : index
    %23 = vector.load %arg3[%c0_8, %c0_9] : memref<1x128xf32, #tpu.memory_space<vmem>>, vector<1x128xf32>
    %24 = vector.broadcast %23 : vector<1x128xf32> to vector<32x128xf32>
    %25 = arith.addf %22, %24 : vector<32x128xf32>
    %26 = arith.truncf %25 : vector<32x128xf32> to vector<32x128xbf16>
    %c0_10 = arith.constant 0 : index
    %c0_11 = arith.constant 0 : index
    %27 = vector.load %arg4[%c0_10, %c0_11] : memref<128x384xbf16, #tpu.memory_space<vmem>>, vector<128x384xbf16>
    %cst_12 = arith.constant dense<0.000000e+00> : vector<32x384xf32>
    %28 = tpu.matmul %26, %27, %cst_12 {dimension_numbers = #tpu.dot_dimension_numbers<[1], [0], [0], [1], [0, 0, 1, 1], [], []>} : vector<32x128xbf16>, vector<128x384xbf16>, vector<32x384xf32> -> vector<32x384xf32>
    %c0_13 = arith.constant 0 : index
    %c0_14 = arith.constant 0 : index
    %29 = vector.load %arg5[%c0_13, %c0_14] : memref<1x384xf32, #tpu.memory_space<vmem>>, vector<1x384xf32>
    %30 = vector.broadcast %29 : vector<1x384xf32> to vector<32x384xf32>
    %31 = arith.addf %28, %30 : vector<32x384xf32>
    %32 = arith.truncf %31 : vector<32x384xf32> to vector<32x384xbf16>
    %33 = tpu.iota {dimensions = array<i32: 1>} : vector<32x32xi32>
    %c17_i32 = arith.constant 17 : i32
    %34 = vector.broadcast %c17_i32 : i32 to vector<32x32xi32>
    %35 = arith.cmpi slt, %33, %34 : vector<32x32xi32>
    %36 = vector.extract_strided_slice %32 {offsets = [0, 0], sizes = [32, 64], strides = [1, 1]} : vector<32x384xbf16> to vector<32x64xbf16>
    %37 = vector.extract_strided_slice %32 {offsets = [0, 64], sizes = [32, 64], strides = [1, 1]} : vector<32x384xbf16> to vector<32x64xbf16>
    %38 = vector.extract_strided_slice %32 {offsets = [0, 128], sizes = [32, 64], strides = [1, 1]} : vector<32x384xbf16> to vector<32x64xbf16>
    %cst_15 = arith.constant dense<0.000000e+00> : vector<32x32xf32>
    %39 = tpu.matmul %36, %37, %cst_15 {dimension_numbers = #tpu.dot_dimension_numbers<[1], [1], [0], [0], [0, 0, 1, 0], [], []>} : vector<32x64xbf16>, vector<32x64xbf16>, vector<32x32xf32> -> vector<32x32xf32>
    %cst_16 = arith.constant -1.000000e+30 : f32
    %40 = vector.broadcast %cst_16 : f32 to vector<32x32xf32>
    %41 = arith.select %35, %39, %40 : vector<32x32xi1>, vector<32x32xf32>
    %cst_17 = arith.constant dense<0xFF800000> : vector<32xf32>
    %42 = vector.multi_reduction <maximumf>, %41, %cst_17 [1] : vector<32x32xf32> to vector<32xf32>
    %43 = vector.shape_cast %42 : vector<32xf32> to vector<32x1xf32>
    %44 = vector.broadcast %43 : vector<32x1xf32> to vector<32x32xf32>
    %45 = arith.subf %41, %44 : vector<32x32xf32>
    %46 = math.exp %45 : vector<32x32xf32>
    %cst_18 = arith.constant dense<0.000000e+00> : vector<32xf32>
    %47 = vector.multi_reduction <add>, %46, %cst_18 [1] : vector<32x32xf32> to vector<32xf32>
    %48 = vector.shape_cast %47 : vector<32xf32> to vector<32x1xf32>
    %49 = tpu.reciprocal %48 {approx = true} : vector<32x1xf32> -> vector<32x1xf32>
    %50 = vector.broadcast %49 : vector<32x1xf32> to vector<32x32xf32>
    %51 = arith.mulf %46, %50 : vector<32x32xf32>
    %52 = arith.truncf %51 : vector<32x32xf32> to vector<32x32xbf16>
    %cst_19 = arith.constant dense<0.000000e+00> : vector<32x64xf32>
    %53 = tpu.matmul %52, %38, %cst_19 {dimension_numbers = #tpu.dot_dimension_numbers<[1], [0], [0], [1], [0, 0, 1, 1], [], []>} : vector<32x32xbf16>, vector<32x64xbf16>, vector<32x64xf32> -> vector<32x64xf32>
    %54 = arith.truncf %53 : vector<32x64xf32> to vector<32x64xbf16>
    %c0_20 = arith.constant 0 : index
    %c0_21 = arith.constant 0 : index
    %55 = vector.load %arg17[%c0_20, %c0_21] : memref<32x128xbf16, #tpu.memory_space<vmem>>, vector<32x64xbf16>
    tpu.vector_store %arg17[%c0_20, %c0_21], %54 {strides = array<i32>} : memref<32x128xbf16, #tpu.memory_space<vmem>>, vector<32x64xbf16>,
    %56 = vector.extract_strided_slice %32 {offsets = [0, 192], sizes = [32, 64], strides = [1, 1]} : vector<32x384xbf16> to vector<32x64xbf16>
    %57 = vector.extract_strided_slice %32 {offsets = [0, 256], sizes = [32, 64], strides = [1, 1]} : vector<32x384xbf16> to vector<32x64xbf16>
    %58 = vector.extract_strided_slice %32 {offsets = [0, 320], sizes = [32, 64], strides = [1, 1]} : vector<32x384xbf16> to vector<32x64xbf16>
    %cst_22 = arith.constant dense<0.000000e+00> : vector<32x32xf32>
    %59 = tpu.matmul %56, %57, %cst_22 {dimension_numbers = #tpu.dot_dimension_numbers<[1], [1], [0], [0], [0, 0, 1, 0], [], []>} : vector<32x64xbf16>, vector<32x64xbf16>, vector<32x32xf32> -> vector<32x32xf32>
    %cst_23 = arith.constant -1.000000e+30 : f32
    %60 = vector.broadcast %cst_23 : f32 to vector<32x32xf32>
    %61 = arith.select %35, %59, %60 : vector<32x32xi1>, vector<32x32xf32>
    %cst_24 = arith.constant dense<0xFF800000> : vector<32xf32>
    %62 = vector.multi_reduction <maximumf>, %61, %cst_24 [1] : vector<32x32xf32> to vector<32xf32>
    %63 = vector.shape_cast %62 : vector<32xf32> to vector<32x1xf32>
    %64 = vector.broadcast %63 : vector<32x1xf32> to vector<32x32xf32>
    %65 = arith.subf %61, %64 : vector<32x32xf32>
    %66 = math.exp %65 : vector<32x32xf32>
    %cst_25 = arith.constant dense<0.000000e+00> : vector<32xf32>
    %67 = vector.multi_reduction <add>, %66, %cst_25 [1] : vector<32x32xf32> to vector<32xf32>
    %68 = vector.shape_cast %67 : vector<32xf32> to vector<32x1xf32>
    %69 = tpu.reciprocal %68 {approx = true} : vector<32x1xf32> -> vector<32x1xf32>
    %70 = vector.broadcast %69 : vector<32x1xf32> to vector<32x32xf32>
    %71 = arith.mulf %66, %70 : vector<32x32xf32>
    %72 = arith.truncf %71 : vector<32x32xf32> to vector<32x32xbf16>
    %cst_26 = arith.constant dense<0.000000e+00> : vector<32x64xf32>
    %73 = tpu.matmul %72, %58, %cst_26 {dimension_numbers = #tpu.dot_dimension_numbers<[1], [0], [0], [1], [0, 0, 1, 1], [], []>} : vector<32x32xbf16>, vector<32x64xbf16>, vector<32x64xf32> -> vector<32x64xf32>
    %74 = arith.truncf %73 : vector<32x64xf32> to vector<32x64xbf16>
    %c0_27 = arith.constant 0 : index
    %c64 = arith.constant 64 : index
    %75 = vector.load %arg17[%c0_27, %c64] : memref<32x128xbf16, #tpu.memory_space<vmem>>, vector<32x64xbf16>
    tpu.vector_store %arg17[%c0_27, %c64], %74 {strides = array<i32>} : memref<32x128xbf16, #tpu.memory_space<vmem>>, vector<32x64xbf16>,
    %c0_28 = arith.constant 0 : index
    %c0_29 = arith.constant 0 : index
    %76 = vector.load %arg17[%c0_28, %c0_29] : memref<32x128xbf16, #tpu.memory_space<vmem>>, vector<32x128xbf16>
    %c0_30 = arith.constant 0 : index
    %c0_31 = arith.constant 0 : index
    %77 = vector.load %arg6[%c0_30, %c0_31] : memref<128x128xbf16, #tpu.memory_space<vmem>>, vector<128x128xbf16>
    %cst_32 = arith.constant dense<0.000000e+00> : vector<32x128xf32>
    %78 = tpu.matmul %76, %77, %cst_32 {dimension_numbers = #tpu.dot_dimension_numbers<[1], [0], [0], [1], [0, 0, 1, 1], [], []>} : vector<32x128xbf16>, vector<128x128xbf16>, vector<32x128xf32> -> vector<32x128xf32>
    %c0_33 = arith.constant 0 : index
    %c0_34 = arith.constant 0 : index
    %79 = vector.load %arg7[%c0_33, %c0_34] : memref<1x128xf32, #tpu.memory_space<vmem>>, vector<1x128xf32>
    %80 = vector.broadcast %79 : vector<1x128xf32> to vector<32x128xf32>
    %81 = arith.addf %78, %80 : vector<32x128xf32>
    %c0_35 = arith.constant 0 : index
    %c0_36 = arith.constant 0 : index
    %82 = vector.load %arg8[%c0_35, %c0_36] : memref<1x128xf32, #tpu.memory_space<vmem>>, vector<1x128xf32>
    %83 = vector.broadcast %82 : vector<1x128xf32> to vector<32x128xf32>
    %84 = arith.mulf %81, %83 : vector<32x128xf32>
    %85 = arith.addf %1, %84 : vector<32x128xf32>
    %cst_37 = arith.constant dense<0.000000e+00> : vector<32xf32>
    %86 = vector.multi_reduction <add>, %85, %cst_37 [1] : vector<32x128xf32> to vector<32xf32>
    %87 = vector.shape_cast %86 : vector<32xf32> to vector<32x1xf32>
    %cst_38 = arith.constant 1.280000e+02 : f32
    %88 = vector.broadcast %cst_38 : f32 to vector<32x1xf32>
    %89 = arith.divf %87, %88 : vector<32x1xf32>
    %90 = vector.broadcast %89 : vector<32x1xf32> to vector<32x128xf32>
    %91 = arith.subf %85, %90 : vector<32x128xf32>
    %92 = arith.mulf %91, %91 : vector<32x128xf32>
    %cst_39 = arith.constant dense<0.000000e+00> : vector<32xf32>
    %93 = vector.multi_reduction <add>, %92, %cst_39 [1] : vector<32x128xf32> to vector<32xf32>
    %94 = vector.shape_cast %93 : vector<32xf32> to vector<32x1xf32>
    %cst_40 = arith.constant 1.280000e+02 : f32
    %95 = vector.broadcast %cst_40 : f32 to vector<32x1xf32>
    %96 = arith.divf %94, %95 : vector<32x1xf32>
    %97 = vector.broadcast %89 : vector<32x1xf32> to vector<32x128xf32>
    %98 = arith.subf %85, %97 : vector<32x128xf32>
    %cst_41 = arith.constant 9.99999997E-7 : f32
    %99 = vector.broadcast %cst_41 : f32 to vector<32x1xf32>
    %100 = arith.addf %96, %99 : vector<32x1xf32>
    %101 = math.rsqrt %100 : vector<32x1xf32>
    %102 = vector.broadcast %101 : vector<32x1xf32> to vector<32x128xf32>
    %103 = arith.mulf %98, %102 : vector<32x128xf32>
    %c0_42 = arith.constant 0 : index
    %c0_43 = arith.constant 0 : index
    %104 = vector.load %arg9[%c0_42, %c0_43] : memref<1x128xf32, #tpu.memory_space<vmem>>, vector<1x128xf32>
    %105 = vector.broadcast %104 : vector<1x128xf32> to vector<32x128xf32>
    %106 = arith.mulf %103, %105 : vector<32x128xf32>
    %c0_44 = arith.constant 0 : index
    %c0_45 = arith.constant 0 : index
    %107 = vector.load %arg10[%c0_44, %c0_45] : memref<1x128xf32, #tpu.memory_space<vmem>>, vector<1x128xf32>
    %108 = vector.broadcast %107 : vector<1x128xf32> to vector<32x128xf32>
    %109 = arith.addf %106, %108 : vector<32x128xf32>
    %110 = arith.truncf %109 : vector<32x128xf32> to vector<32x128xbf16>
    %c0_46 = arith.constant 0 : index
    %c0_47 = arith.constant 0 : index
    %111 = vector.load %arg11[%c0_46, %c0_47] : memref<128x512xbf16, #tpu.memory_space<vmem>>, vector<128x512xbf16>
    %cst_48 = arith.constant dense<0.000000e+00> : vector<32x512xf32>
    %112 = tpu.matmul %110, %111, %cst_48 {dimension_numbers = #tpu.dot_dimension_numbers<[1], [0], [0], [1], [0, 0, 1, 1], [], []>} : vector<32x128xbf16>, vector<128x512xbf16>, vector<32x512xf32> -> vector<32x512xf32>
    %c0_49 = arith.constant 0 : index
    %c0_50 = arith.constant 0 : index
    %113 = vector.load %arg12[%c0_49, %c0_50] : memref<1x512xf32, #tpu.memory_space<vmem>>, vector<1x512xf32>
    %114 = vector.broadcast %113 : vector<1x512xf32> to vector<32x512xf32>
    %115 = arith.addf %112, %114 : vector<32x512xf32>
    %116 = arith.mulf %115, %115 : vector<32x512xf32>
    %117 = arith.mulf %115, %116 : vector<32x512xf32>
    %cst_51 = arith.constant 4.471500e-02 : f32
    %118 = vector.broadcast %cst_51 : f32 to vector<32x512xf32>
    %119 = arith.mulf %118, %117 : vector<32x512xf32>
    %120 = arith.addf %115, %119 : vector<32x512xf32>
    %cst_52 = arith.constant 0.797884583 : f32
    %121 = vector.broadcast %cst_52 : f32 to vector<32x512xf32>
    %122 = arith.mulf %121, %120 : vector<32x512xf32>
    %123 = math.tanh %122 : vector<32x512xf32>
    %cst_53 = arith.constant 1.000000e+00 : f32
    %124 = vector.broadcast %cst_53 : f32 to vector<32x512xf32>
    %125 = arith.addf %124, %123 : vector<32x512xf32>
    %cst_54 = arith.constant 5.000000e-01 : f32
    %126 = vector.broadcast %cst_54 : f32 to vector<32x512xf32>
    %127 = arith.mulf %126, %125 : vector<32x512xf32>
    %128 = arith.mulf %115, %127 : vector<32x512xf32>
    %129 = arith.truncf %128 : vector<32x512xf32> to vector<32x512xbf16>
    %c0_55 = arith.constant 0 : index
    %c0_56 = arith.constant 0 : index
    %130 = vector.load %arg13[%c0_55, %c0_56] : memref<512x128xbf16, #tpu.memory_space<vmem>>, vector<512x128xbf16>
    %cst_57 = arith.constant dense<0.000000e+00> : vector<32x128xf32>
    %131 = tpu.matmul %129, %130, %cst_57 {dimension_numbers = #tpu.dot_dimension_numbers<[1], [0], [0], [1], [0, 0, 1, 1], [], []>} : vector<32x512xbf16>, vector<512x128xbf16>, vector<32x128xf32> -> vector<32x128xf32>
    %c0_58 = arith.constant 0 : index
    %c0_59 = arith.constant 0 : index
    %132 = vector.load %arg14[%c0_58, %c0_59] : memref<1x128xf32, #tpu.memory_space<vmem>>, vector<1x128xf32>
    %133 = vector.broadcast %132 : vector<1x128xf32> to vector<32x128xf32>
    %134 = arith.addf %131, %133 : vector<32x128xf32>
    %c0_60 = arith.constant 0 : index
    %c0_61 = arith.constant 0 : index
    %135 = vector.load %arg15[%c0_60, %c0_61] : memref<1x128xf32, #tpu.memory_space<vmem>>, vector<1x128xf32>
    %136 = vector.broadcast %135 : vector<1x128xf32> to vector<32x128xf32>
    %137 = arith.mulf %134, %136 : vector<32x128xf32>
    %138 = arith.addf %85, %137 : vector<32x128xf32>
    %c0_62 = arith.constant 0 : index
    %c0_63 = arith.constant 0 : index
    %c0_64 = arith.constant 0 : index
    %139 = vector.load %arg16[%c0_62, %c0_63, %c0_64] : memref<1x32x128xf32, #tpu.memory_space<vmem>>, vector<1x32x128xf32>
    %140 = vector.shape_cast %139 : vector<1x32x128xf32> to vector<32x128xf32>
    %141 = vector.shape_cast %138 : vector<32x128xf32> to vector<1x32x128xf32>
    tpu.vector_store %arg16[%c0_62, %c0_63, %c0_64], %141 {strides = array<i32>} : memref<1x32x128xf32, #tpu.memory_space<vmem>>, vector<1x32x128xf32>,
    return
  }
  func.func @transform_0(%arg0: i32) -> (i32, i32, i32) {
    %c0_i32 = arith.constant 0 : i32
    %c0_i32_0 = arith.constant 0 : i32
    %c0_i32_1 = arith.constant 0 : i32
    return %arg0, %c0_i32, %c0_i32_0 : i32, i32, i32
  }
  func.func @transform_1(%arg0: i32) -> (i32, i32) {
    %c0_i32 = arith.constant 0 : i32
    %c0_i32_0 = arith.constant 0 : i32
    %c0_i32_1 = arith.constant 0 : i32
    return %c0_i32, %c0_i32_0 : i32, i32
  }
  func.func @transform_2(%arg0: i32) -> (i32, i32) {
    %c0_i32 = arith.constant 0 : i32
    %c0_i32_0 = arith.constant 0 : i32
    %c0_i32_1 = arith.constant 0 : i32
    return %c0_i32, %c0_i32_0 : i32, i32
  }
  func.func @transform_3(%arg0: i32) -> (i32, i32) {
    %c0_i32 = arith.constant 0 : i32
    %c0_i32_0 = arith.constant 0 : i32
    %c0_i32_1 = arith.constant 0 : i32
    return %c0_i32, %c0_i32_0 : i32, i32
  }
  func.func @transform_4(%arg0: i32) -> (i32, i32) {
    %c0_i32 = arith.constant 0 : i32
    %c0_i32_0 = arith.constant 0 : i32
    %c0_i32_1 = arith.constant 0 : i32
    return %c0_i32, %c0_i32_0 : i32, i32
  }
  func.func @transform_5(%arg0: i32) -> (i32, i32) {
    %c0_i32 = arith.constant 0 : i32
    %c0_i32_0 = arith.constant 0 : i32
    %c0_i32_1 = arith.constant 0 : i32
    return %c0_i32, %c0_i32_0 : i32, i32
  }
  func.func @transform_6(%arg0: i32) -> (i32, i32) {
    %c0_i32 = arith.constant 0 : i32
    %c0_i32_0 = arith.constant 0 : i32
    %c0_i32_1 = arith.constant 0 : i32
    return %c0_i32, %c0_i32_0 : i32, i32
  }
  func.func @transform_7(%arg0: i32) -> (i32, i32) {
    %c0_i32 = arith.constant 0 : i32
    %c0_i32_0 = arith.constant 0 : i32
    %c0_i32_1 = arith.constant 0 : i32
    return %c0_i32, %c0_i32_0 : i32, i32
  }
  func.func @transform_8(%arg0: i32) -> (i32, i32) {
    %c0_i32 = arith.constant 0 : i32
    %c0_i32_0 = arith.constant 0 : i32
    %c0_i32_1 = arith.constant 0 : i32
    return %c0_i32, %c0_i32_0 : i32, i32
  }
  func.func @transform_9(%arg0: i32) -> (i32, i32) {
    %c0_i32 = arith.constant 0 : i32
    %c0_i32_0 = arith.constant 0 : i32
    %c0_i32_1 = arith.constant 0 : i32
    return %c0_i32, %c0_i32_0 : i32, i32
  }
  func.func @transform_10(%arg0: i32) -> (i32, i32) {
    %c0_i32 = arith.constant 0 : i32
    %c0_i32_0 = arith.constant 0 : i32
    %c0_i32_1 = arith.constant 0 : i32
    return %c0_i32, %c0_i32_0 : i32, i32
  }
  func.func @transform_11(%arg0: i32) -> (i32, i32) {
    %c0_i32 = arith.constant 0 : i32
    %c0_i32_0 = arith.constant 0 : i32
    %c0_i32_1 = arith.constant 0 : i32
    return %c0_i32, %c0_i32_0 : i32, i32
  }
  func.func @transform_12(%arg0: i32) -> (i32, i32) {
    %c0_i32 = arith.constant 0 : i32
    %c0_i32_0 = arith.constant 0 : i32
    %c0_i32_1 = arith.constant 0 : i32
    return %c0_i32, %c0_i32_0 : i32, i32
  }
  func.func @transform_13(%arg0: i32) -> (i32, i32) {
    %c0_i32 = arith.constant 0 : i32
    %c0_i32_0 = arith.constant 0 : i32
    %c0_i32_1 = arith.constant 0 : i32
    return %c0_i32, %c0_i32_0 : i32, i32
  }
  func.func @transform_14(%arg0: i32) -> (i32, i32) {
    %c0_i32 = arith.constant 0 : i32
    %c0_i32_0 = arith.constant 0 : i32
    %c0_i32_1 = arith.constant 0 : i32
    return %c0_i32, %c0_i32_0 : i32, i32
  }
  func.func @transform_15(%arg0: i32) -> (i32, i32, i32) {
    %c0_i32 = arith.constant 0 : i32
    %c0_i32_0 = arith.constant 0 : i32
    %c0_i32_1 = arith.constant 0 : i32
    return %arg0, %c0_i32, %c0_i32_0 : i32, i32, i32
  }
}

</mosaic_0001>

<bundles_post_ra>
// kernel: _lambda_.7
= control target key start
LH: loop header
LB: loop body
LE: loop exit
PB: predicated region body
PF: predicated region fallthrough
CT: control target
= control target key end

     0   :  { %vm16_vm0 = vcmask 1041408   ;;  %s143_s0 = inlined_call_operand.vmem [shape: f32[2,128], index: 0, kind: input, shape index: {}]   ;;  %s144_s1 = inlined_call_operand.vmem [shape: f32[1,128], index: 1, kind: input, shape index: {}]   ;;  %s145_s2 = inlined_call_operand.vmem [shape: f32[1,128], index: 2, kind: input, shape index: {}]   ;;  %s146_s3 = inlined_call_operand.hbm [shape: f32[2,128], index: 3, kind: output, shape index: {}]  }
   0x1   :  { %v15_v0 = vld [vmem:[%s143_s0] sm:$0x3] }
   0x2   :  { %8 = vsyncpa [#allocation3], 0  ;;  %v17_v1 = vsel %vm16_vm0, %v15_v0, 0.0  ;;  %v107_v2 = vmov 128.0   ;;  %v75_v23 = vld [vmem:[%s144_s1] ss:$0 sm:$0xff] }
   0x3   :  { %18 = vadd.xlane.f32.xlu0 %v17_v1  ;;  %77 = vrcp.f32 %v107_v2  ;;  %v76_v26 = vld [vmem:[%s145_s2] ss:$0 sm:$0xff]  ;;  %s108_s17 = smov [#allocation2]   ;;  %s64_s21 = sshll.u32 %s146_s3, 4  ;;  %s65_s21 = int_to_ptr.hbm [resolvable:$true] %s64_s21 }
   0x4   :  { %s62_s18 = sshll.u32 %s108_s17, 4  ;;  %s63_s18 = int_to_ptr.vmem [resolvable:$true] %s62_s18 }
   0x9   :  { %v78_v3 = vpop.eup %77 }
   0xa   :  { %v21_v4 = vmul.f32 128.0, %v78_v3  ;;  %vm25_vm1 = vweird.f32 %v78_v3 }
   0xc   :  { %v22_v5 = vsub.f32 1.0, %v21_v4 }
   0xe   :  { %v23_v6 = vmul.f32 %v78_v3, %v22_v5 }
  0x10   :  { %v24_v7 = vadd.f32 %v78_v3, %v23_v6 }
  0x12   :  { %v26_v8 = vsel %vm25_vm1, %v78_v3, %v24_v7 }
  0x76   :  { %v19_v9 = vpop.xlane.xlu0 %18 }
  0x77   :  { %v27_v10 = vmul.f32 %v26_v8, %v19_v9 }
  0x79   :  { %v28_v11 = vsub.f32 %v15_v0, %v27_v10 }
  0x7b   :  { %v29_v12 = vmul.f32 %v28_v11, %v28_v11 }
  0x7d   :  { %v30_v13 = vsel %vm16_vm0, %v29_v12, 0.0 }
  0x7e   :  { %31 = vadd.xlane.f32.xlu0 %v30_v13 }
  0xf1   :  { %v32_v14 = vpop.xlane.xlu0 %31 }
  0xf2   :  { %v33_v15 = vmul.f32 %v32_v14, %v26_v8 }
  0xf4   :  { %v34_v16 = vadd.f32 1e-06, %v33_v15 }
  0xf6   :  { %79 = vrsqrt.f32 %v34_v16  ;;  %vm41_vm3 = vweird.f32 %v34_v16 }
  0xfc   :  { %v80_v17 = vpop.eup %79 }
  0xfd   :  { %v36_v18 = vmul.f32 %v80_v17, %v34_v16  ;;  %vm42_vm2 = vweird.f32 %v80_v17 }
  0xfe   :  { %vm43_vm4 = vmor %vm41_vm3, %vm42_vm2 }
  0xff   :  { %v37_v19 = vmul.f32 %v80_v17, %v36_v18 }
 0x101   :  { %v38_v20 = vmul.f32 0.5, %v37_v19 }
 0x103   :  { %v39_v21 = vsub.f32 1.5, %v38_v20 }
 0x105   :  { %v40_v22 = vmul.f32 %v80_v17, %v39_v21 }
 0x107   :  { %v44_v24 = vsel %vm43_vm4, %v80_v17, %v40_v22 }
 0x108   :  { %v45_v25 = vmul.f32 %v44_v24, %v28_v11 }
 0x10a   :  { %v50_v27 = vmul.f32 %v75_v23, %v45_v25 }
 0x10c   :  { %v55_v28 = vadd.f32 %v76_v26, %v50_v27 }
 0x10e   :  { %56 = vst [vmem:[#allocation2] sm:$0x3] %v55_v28 }
 0x10f   :  { %67 = dma.vmem_to_hbm [thread:$0]  %s63_s18, 32, %s65_s21, [#allocation3]  }
 0x110   :  { %105 = dma.done.wait [#allocation3], 32  }
 0x111   :  { %106 = vsyncadd [#allocation3], 4294967264 }
 0x112   :  { %72 = vsyncpa [#allocation3], 1 }

// kernel: _lambda_.4
= control target key start
LH: loop header
LB: loop body
LE: loop exit
PB: predicated region body
PF: predicated region fallthrough
CT: control target
= control target key end

     0   :  { %10 = vsyncpa [#allocation3], 0  ;;  %s780_s0 = inlined_call_operand.vmem [shape: bf16[2,16,128], index: 0, kind: input, shape index: {}]   ;;  %s781_s1 = inlined_call_operand.hbm [shape: bf16[128,128], index: 1, kind: input, shape index: {}]   ;;  %s782_s2 = inlined_call_operand.vmem [shape: f32[1,128], index: 2, kind: input, shape index: {}]   ;;  %s783_s3 = inlined_call_operand.hbm [shape: f32[16,128], index: 3, kind: input, shape index: {}]   ;;  %s784_s4 = inlined_call_operand.hbm [shape: f32[16,128], index: 4, kind: input, shape index: {}]   ;;  %s785_s5 = inlined_call_operand.vmem [shape: f32[2,32,128], index: 5, kind: output, shape index: {}]  }
   0x1   :  { %11 = vsyncpa [#allocation5], 0  ;;  %s712_s18 = smov 0  }
   0x2 LB: > { %s186_s21 = sshll.u32 %s783_s3, 4  ;;  %s721_s22 = sadd.s32 4294967295, %s673_s18   ;;  %s673_s18 = sphi %s712_s18, %s17_s18   ;;  %s187_s21 = int_to_ptr.hbm [resolvable:$true] %s186_s21 }
   0x3   : > { %p463_p0 = scmp.ge.s32.totalorder %s673_s18, 1  ;;  %p158_p1 = scmp.lt.s32.totalorder %s673_s18, 3 }
   0x4   : > { %p547_p2 = scmp.eq.s32.totalorder %s721_s22, 0  ;;  %s675_s24 = smov [#allocation4]  }
   0x5   : > { %p726_p3 = pnand %p463_p0, %p158_p1  ;;  %s188_s25 = sshll.u32 %s675_s24, 4  ;;  %s189_s25 = int_to_ptr.vmem [resolvable:$true] %s188_s25 }
   0x6   : > { %s169_s28 = sshll.u32 %s781_s1, 4  ;;  %s676_s30 = smov [#allocation2]   ;;  %s170_s28 = int_to_ptr.hbm [resolvable:$true] %s169_s28 }
   0x7   : > { %p537_p4 = pneg %p726_p3  ;;  %s171_s6 = sshll.u32 %s676_s30, 4  ;;  %s172_s6 = int_to_ptr.vmem [resolvable:$true] %s171_s6 }
   0x8   : > { %s677_s7 = smov 128   ;;  %s678_s8 = smov 8  }
   0x9   : > { %p737_p5 = pnand %p547_p2, %p537_p4  ;;  %s200_s11 = sshll.u32 %s784_s4, 4  ;;  %s201_s11 = int_to_ptr.hbm [resolvable:$true] %s200_s11 }
   0xa   : > { %s679_s12 = smov 64   ;;  %s680_s13 = smov 4  }
   0xb   : > { %543 = dma.hbm_to_vmem [thread:$0]  (!%p737_p5), %s187_s21, 256, %s189_s25, [#allocation5], %s677_s7, %s677_s7, %s678_s8  }
   0xc   : > { %540 = dma.hbm_to_vmem [thread:$0]  (!%p737_p5), %s170_s28, 1024, %s172_s6, [#allocation3], %s679_s12, %s679_s12, %s680_s13  }
   0xd   : > { %s681_s14 = smov [#allocation6]   ;;  %226 = sbr.rel (%p726_p3) target bundleno = 192 (0xc0), region = 40 }
   0xe   : > { %s202_s15 = sshll.u32 %s681_s14, 4  ;;  %s203_s15 = int_to_ptr.vmem [resolvable:$true] %s202_s15 }
   0xf   : > { %546 = dma.hbm_to_vmem [thread:$0]  (!%p737_p5), %s201_s11, 256, %s203_s15, [#allocation5], %s677_s7, %s677_s7, %s678_s8  }
  0x12   : > { %664 = dma.done.wait (%p547_p2), [#allocation3], 1024  }
  0x13   : > { %666 = vsyncadd (%p547_p2), [#allocation3], 4294966272 }
  0x14   : > { %668 = dma.done.wait (%p547_p2), [#allocation5], 512  }
  0x15   : > { %670 = vsyncadd (%p547_p2), [#allocation5], 4294966784  ;;  %p265_p6 = scmp.lt.s32.totalorder %s721_s22, 1  ;;  %v524_v0 = vld [vmem:[#allocation2 + $0x38] sm:$0xff]  ;;  %v523_v1 = vld [vmem:[#allocation2 + $0x30] sm:$0xff] }
  0x16   : > { %351 = vmatpush.bf16.msra.mxu0 %v524_v0  ;;  %v371_v2 = vld [vmem:[#allocation6] sm:$0xff]  ;;  %v372_v3 = vld [vmem:[#allocation6 + $0x8] sm:$0xff]  ;;  %v522_v4 = vld [vmem:[#allocation2 + $0x28] sm:$0xff] }
  0x17   : > { %s789_s22 = smov (!%p265_p6, %s721_s22), 1  ;;  %v521_v5 = vld [vmem:[#allocation2 + $0x20] sm:$0xff]  ;;  %v520_v6 = vld [vmem:[#allocation2 + $0x18] sm:$0xff]  ;;  %v519_v7 = vld [vmem:[#allocation2 + $0x10] sm:$0xff] }
  0x18   : > { %s515_s16 = sshll.u32 %s789_s22, 5  ;;  %v518_v8 = vld [vmem:[#allocation2 + $0x8] sm:$0xff]  ;;  %s514_s21 = sshll.u32 %s789_s22, 3  ;;  %v517_v9 = vld [vmem:[#allocation2] sm:$0xff] }
  0x19   : > { %s765_s20 = scalar_lea.vmem %s785_s5, %s515_s16  ;;  %s269_s25 = scalar_lea.vmem %s780_s0, %s514_s21  ;;  %v568_v11 = vld [vmem:[%s782_s2] ss:$0 sm:$0xff]  ;;  %v366_v17 = vld [vmem:[#allocation4 + $0x8] sm:$0xff] }
  0x1a   : > { %373 = vst [vmem:[%s765_s20 + $0x10] sm:$0xff] %v371_v2  ;;  %352 = vmatpush.bf16.msra.mxu0 %v523_v1  ;;  %v516_v10 = vld [vmem:[%s269_s25] sm:$0xff] }
  0x1b   : > { %374 = vst [vmem:[%s765_s20 + $0x18] sm:$0xff] %v372_v3  ;;  %v365_v13 = vld [vmem:[#allocation4] sm:$0xff] }
  0x1e   : > { %353 = vmatpush.bf16.msra.mxu0 %v522_v4 }
  0x22   : > { %354 = vmatpush.bf16.msra.mxu0 %v521_v5 }
  0x26   : > { %355 = vmatpush.bf16.msra.mxu0 %v520_v6 }
  0x2a   : > { %356 = vmatpush.bf16.msra.mxu0 %v519_v7 }
  0x2e   : > { %357 = vmatpush.bf16.msra.mxu0 %v518_v8 }
  0x32   : > { %358 = vmatpush.bf16.msra.mxu0 %v517_v9 }
  0x35   : > { %359 = vmatmul.bf16.vlgmr.msra.gmra.mxu0 %v516_v10 }
  0xb2   : > { %v360_v12 = vpop.f32.mrf.mxu0 }
  0xb3   : > { %v361_v14 = vadd.f32 %v568_v11, %v360_v12 }
  0xb5   : > { %v367_v15 = vadd.f32 %v365_v13, %v361_v14 }
  0xb7   : > { %369 = vst [vmem:[%s765_s20] sm:$0xff] %v367_v15 }
  0xba   : > { %v362_v16 = vpop.f32.mrf.mxu0 }
  0xbb   : > { %v363_v18 = vadd.f32 %v568_v11, %v362_v16 }
  0xbd   : > { %v368_v19 = vadd.f32 %v366_v17, %v363_v18 }
  0xbf   : > { %370 = vst [vmem:[%s765_s20 + $0x8] sm:$0xff] %v368_v19 }
  0xc0 PF: > { %s17_s18 = sadd.s32 1, %s673_s18  }
  0xc1   : > { %p14_p7 = scmp.ge.s32.totalorder %s17_s18, 4  }
  0xc3   :  { %16 = sbr.rel (!%p14_p7) target bundleno = 2 (0x2), region = 83 }
  0xc8   :  { %396 = vsyncpa [#allocation3], 1 }
  0xc9   :  { %398 = vsyncpa [#allocation3 + $0x1], 1 }
  0xca   :  { %399 = vsyncpa [#allocation5], 1 }

// kernel: _lambda_.5
= control target key start
LH: loop header
LB: loop body
LE: loop exit
PB: predicated region body
PF: predicated region fallthrough
CT: control target
= control target key end

     0   :  { %20 = vsyncpa [#allocation4], 0  ;;  %s3696_s0 = inlined_call_operand.vmem [shape: f32[2,32,128], index: 0, kind: input, shape index: {}]   ;;  %s3697_s1 = inlined_call_operand.vmem [shape: f32[1,128], index: 1, kind: input, shape index: {}, may-alias: {1,8}]   ;;  %s3698_s2 = inlined_call_operand.vmem [shape: f32[1,128], index: 2, kind: input, shape index: {}, may-alias: {2,6,9,13}]   ;;  %s3699_s3 = inlined_call_operand.hbm [shape: bf16[128,384], index: 3, kind: input, shape index: {}]   ;;  %s3700_s4 = inlined_call_operand.vmem [shape: f32[1,384], index: 4, kind: input, shape index: {}]   ;;  %s3701_s5 = inlined_call_operand.hbm [shape: bf16[128,128], index: 5, kind: input, shape index: {}]   ;;  %s3702_s6 = inlined_call_operand.vmem [shape: f32[1,128], index: 6, kind: input, shape index: {}, may-alias: {2,6,9,13}]   ;;  %s3703_s7 = inlined_call_operand.vmem [shape: f32[1,128], index: 7, kind: input, shape index: {}, may-alias: {7,14}]   ;;  %s3704_s8 = inlined_call_operand.vmem [shape: f32[1,128], index: 8, kind: input, shape index: {}, may-alias: {1,8}]   ;;  %s3705_s9 = inlined_call_operand.vmem [shape: f32[1,128], index: 9, kind: input, shape index: {}, may-alias: {2,6,9,13}]   ;;  %s3706_s10 = inlined_call_operand.vmem [shape: bf16[128,512], index: 10, kind: input, shape index: {}]   ;;  %s3707_s11 = inlined_call_operand.vmem [shape: f32[1,512], index: 11, kind: input, shape index: {}]   ;;  %s3708_s12 = inlined_call_operand.vmem [shape: bf16[512,128], index: 12, kind: input, shape index: {}]   ;;  %s3709_s13 = inlined_call_operand.vmem [shape: f32[1,128], index: 13, kind: input, shape index: {}, may-alias: {2,6,9,13}]   ;;  %s3710_s14 = inlined_call_operand.vmem [shape: f32[1,128], index: 14, kind: input, shape index: {}, may-alias: {7,14}]   ;;  %s3711_s15 = inlined_call_operand.vmem [shape: f32[2,32,128], index: 15, kind: output, shape index: {}]  }
   0x1   :  { %21 = vsyncpa [#allocation6], 0  ;;  %s3041_s18 = smov 0  }
   0x2 LB: > { %s395_s21 = sshll.u32 %s3699_s3, 4  ;;  %s2237_s22 = sadd.s32 4294967295, %s2951_s18   ;;  %s2951_s18 = sphi %s3041_s18, %s27_s18   ;;  %s396_s21 = int_to_ptr.hbm [resolvable:$true] %s395_s21 }
   0x3   : > { %p2239_p0 = scmp.ge.s32.totalorder %s2951_s18, 1  ;;  %p378_p1 = scmp.lt.s32.totalorder %s2951_s18, 3 }
   0x4   : > { %p2767_p2 = scmp.eq.s32.totalorder %s2237_s22, 0  ;;  %s2953_s24 = smov [#allocation3]  }
   0x5   : > { %p3052_p3 = pnand %p2239_p0, %p378_p1  ;;  %s397_s25 = sshll.u32 %s2953_s24, 4  ;;  %s398_s25 = int_to_ptr.vmem [resolvable:$true] %s397_s25 }
   0x6   : > { %s412_s28 = sshll.u32 %s3701_s5, 4  ;;  %s2954_s29 = smov [#allocation5]   ;;  %s413_s28 = int_to_ptr.hbm [resolvable:$true] %s412_s28 }
   0x7   : > { %p2760_p4 = pneg %p3052_p3  ;;  %s414_s30 = sshll.u32 %s2954_s29, 4  ;;  %s415_s30 = int_to_ptr.vmem [resolvable:$true] %s414_s30 }
   0x8   : > { %s2955_s16 = smov 192   ;;  %s2956_s17 = smov 12  }
   0x9   : > { %p2761_p5 = pnand %p2767_p2, %p2760_p4  ;;  %s2957_s19 = smov 64  }
   0xa   : > { %s2958_s20 = smov 4   ;;  %465 = sbr.rel (%p3052_p3) target bundleno = 1950 (0x79e), region = 80 }
   0xb   : > { %2763 = dma.hbm_to_vmem [thread:$0]  (!%p2761_p5), %s396_s21, 3072, %s398_s25, [#allocation4], %s2955_s16, %s2955_s16, %s2956_s17  }
   0xc   : > { %2766 = dma.hbm_to_vmem [thread:$0]  (!%p2761_p5), %s413_s28, 1024, %s415_s30, [#allocation6], %s2957_s19, %s2957_s19, %s2958_s20  }
   0xf   : > { %2942 = dma.done.wait (%p2767_p2), [#allocation4], 3072  }
  0x10   : > { %2944 = vsyncadd (%p2767_p2), [#allocation4], 4294964224 }
  0x11   : > { %2946 = dma.done.wait (%p2767_p2), [#allocation6], 1024  }
  0x12   : > { %2948 = vsyncadd (%p2767_p2), [#allocation6], 4294966272  ;;  %p519_p6 = scmp.lt.s32.totalorder %s2237_s22, 1  ;;  %v2959_v4 = vmov 128.0   ;;  %v2336_v27 = vld [vmem:[#allocation3 + $0xa8] sm:$0xf] }
  0x13   : > { %2795 = vrcp.f32 %v2959_v4  ;;  %v2676_v28 = vld [vmem:[#allocation3 + $0xb0] sm:$0xf0]  ;;  %v2675_v29 = vld [vmem:[#allocation3 + $0xac] sm:$0xf]  ;;  %v2338_v31 = vld [vmem:[#allocation3 + $0xb4] sm:$0xf0] }
  0x14   : > { %s3714_s22 = smov (!%p519_p6, %s2237_s22), 1  ;;  %v2337_v30 = vor.u32 %v2676_v28, %v2336_v27  ;;  %v2344_v32 = vld [vmem:[#allocation3 + $0xb0] sm:$0xf]  ;;  %v2677_v33 = vld [vmem:[#allocation3 + $0xb8] sm:$0xf0]  ;;  %v2341_v34 = vor.u32 %v2675_v29, %v2338_v31  ;;  %s2960_s17 = smov 64  }
  0x15   : > { %s2652_s21 = sshll.u32 %s3714_s22, 5  ;;  %v2345_v35 = vor.u32 %v2677_v33, %v2344_v32  ;;  %v2324_v36 = vld [vmem:[#allocation3 + $0x90] sm:$0xf]  ;;  %v2673_v37 = vld [vmem:[#allocation3 + $0x98] sm:$0xf0]  ;;  %vm889_vm13 = vcmask 523264  }
  0x16   : > { %s523_s23 = scalar_lea.vmem %s3696_s0, %s2652_s21  ;;  %807 = vmatpush.bf16.msra.mxu0 %v2337_v30  ;;  %826 = vmatpush.bf16.msra.mxu1 %v2341_v34  ;;  %v2672_v38 = vld [vmem:[#allocation3 + $0x94] sm:$0xf]  ;;  %v2325_v39 = vor.u32 %v2673_v37, %v2324_v36  ;;  %v2326_v40 = vld [vmem:[#allocation3 + $0x9c] sm:$0xf0]  ;;  %v2332_v41 = vld [vmem:[#allocation3 + $0x98] sm:$0xf] }
  0x17   : > { %v3076_v0 = vld [vmem:[%s523_s23 + $0x10] sm:$0xff]  ;;  %v3078_v1 = vld [vmem:[%s523_s23] sm:$0xff]  ;;  %v3082_v2 = vld [vmem:[%s523_s23 + $0x18] sm:$0xff]  ;;  %845 = vmatpush.bf16.msra.mxu2 %v2345_v35  ;;  %v2329_v43 = vor.u32 %v2672_v38, %v2326_v40  ;;  %vm925_vm15 = vcmask 261120  }
  0x18   : > { %538 = vadd.xlane.f32.xlu1 %v3076_v0  ;;  %534 = vadd.xlane.f32.xlu0 %v3078_v1  ;;  %v3084_v3 = vld [vmem:[%s523_s23 + $0x8] sm:$0xff]  ;;  %v2674_v42 = vld [vmem:[#allocation3 + $0xa0] sm:$0xf0]  ;;  %v2314_v49 = vld [vmem:[#allocation3 + $0x84] sm:$0xf0]  ;;  %s3683_s23 = scalar_lea.vmem %s3711_s15, %s2652_s21 }
  0x19   : > { %v2796_v5 = vpop.eup %2795  ;;  %v2333_v44 = vor.u32 %v2674_v42, %v2332_v41  ;;  %v2312_v45 = vld [vmem:[#allocation3 + $0x78] sm:$0xf]  ;;  %v2670_v46 = vld [vmem:[#allocation3 + $0x80] sm:$0xf0]  ;;  %v2669_v47 = vld [vmem:[#allocation3 + $0x7c] sm:$0xf] }
  0x1a   : > { %v543_v6 = vmul.f32 128.0, %v2796_v5  ;;  %vm547_vm0 = vweird.f32 %v2796_v5  ;;  %808 = vmatpush.bf16.msra.mxu0 %v2325_v39  ;;  %827 = vmatpush.bf16.msra.mxu1 %v2329_v43  ;;  %v2313_v48 = vor.u32 %v2670_v46, %v2312_v45  ;;  %v2320_v50 = vld [vmem:[#allocation3 + $0x80] sm:$0xf]  ;;  %v2671_v51 = vld [vmem:[#allocation3 + $0x88] sm:$0xf0]  ;;  %v2317_v52 = vor.u32 %v2669_v47, %v2314_v49 }
  0x1b   : > { %846 = vmatpush.bf16.msra.mxu2 %v2333_v44  ;;  %v2321_v53 = vor.u32 %v2671_v51, %v2320_v50  ;;  %v2300_v54 = vld [vmem:[#allocation3 + $0x60] sm:$0xf]  ;;  %v2667_v55 = vld [vmem:[#allocation3 + $0x68] sm:$0xf0]  ;;  %v2666_v56 = vld [vmem:[#allocation3 + $0x64] sm:$0xf] }
  0x1c   : > { %v544_v7 = vsub.f32 1.0, %v543_v6  ;;  %v2301_v57 = vor.u32 %v2667_v55, %v2300_v54  ;;  %v2302_v58 = vld [vmem:[#allocation3 + $0x6c] sm:$0xf0]  ;;  %v2308_v59 = vld [vmem:[#allocation3 + $0x68] sm:$0xf] }
  0x1d   : > { %v2668_v60 = vld [vmem:[#allocation3 + $0x70] sm:$0xf0]  ;;  %v2305_v61 = vor.u32 %v2666_v56, %v2302_v58  ;;  %v2288_v63 = vld [vmem:[#allocation3 + $0x48] sm:$0xf]  ;;  %v2658_v27 = vld [vmem:[#allocation3 + $0x20] sm:$0xf0] }
  0x1e   : > { %v545_v8 = vmul.f32 %v2796_v5, %v544_v7  ;;  %809 = vmatpush.bf16.msra.mxu0 %v2313_v48  ;;  %828 = vmatpush.bf16.msra.mxu1 %v2317_v52  ;;  %v2309_v62 = vor.u32 %v2668_v60, %v2308_v59  ;;  %v2664_v4 = vld [vmem:[#allocation3 + $0x50] sm:$0xf0]  ;;  %v2290_v7 = vld [vmem:[#allocation3 + $0x54] sm:$0xf0]  ;;  %v2657_v28 = vld [vmem:[#allocation3 + $0x1c] sm:$0xf] }
  0x1f   : > { %847 = vmatpush.bf16.msra.mxu2 %v2321_v53  ;;  %v2289_v6 = vor.u32 %v2664_v4, %v2288_v63  ;;  %v2266_v30 = vld [vmem:[#allocation3 + $0x24] sm:$0xf0]  ;;  %v2272_v31 = vld [vmem:[#allocation3 + $0x20] sm:$0xf]  ;;  %v2659_v32 = vld [vmem:[#allocation3 + $0x28] sm:$0xf0] }
  0x20   : > { %540 = vadd.xlane.f32.xlu1 %v3082_v2  ;;  %536 = vadd.xlane.f32.xlu0 %v3084_v3  ;;  %v546_v9 = vadd.f32 %v2796_v5, %v545_v8  ;;  %v2296_v8 = vld [vmem:[#allocation3 + $0x50] sm:$0xf]  ;;  %v2269_v34 = vor.u32 %v2657_v28, %v2266_v30  ;;  %v2273_v35 = vor.u32 %v2659_v32, %v2272_v31  ;;  %v2252_v36 = vld [vmem:[#allocation3] sm:$0xf]  ;;  %v2655_v37 = vld [vmem:[#allocation3 + $0x8] sm:$0xf0] }
  0x21   : > { %v2654_v38 = vld [vmem:[#allocation3 + $0x4] sm:$0xf]  ;;  %v2253_v41 = vor.u32 %v2655_v37, %v2252_v36  ;;  %v2254_v42 = vld [vmem:[#allocation3 + $0xc] sm:$0xf0]  ;;  %v2260_v43 = vld [vmem:[#allocation3 + $0x8] sm:$0xf] }
  0x22   : > { %v3088_v10 = vsel %vm547_vm0, %v2796_v5, %v546_v9  ;;  %810 = vmatpush.bf16.msra.mxu0 %v2301_v57  ;;  %829 = vmatpush.bf16.msra.mxu1 %v2305_v61  ;;  %v2663_v5 = vld [vmem:[#allocation3 + $0x4c] sm:$0xf]  ;;  %v2665_v9 = vld [vmem:[#allocation3 + $0x58] sm:$0xf0]  ;;  %v2656_v44 = vld [vmem:[#allocation3 + $0x10] sm:$0xf0]  ;;  %v2257_v45 = vor.u32 %v2654_v38, %v2254_v42 }
  0x23   : > { %848 = vmatpush.bf16.msra.mxu2 %v2309_v62  ;;  %v2261_v46 = vor.u32 %v2656_v44, %v2260_v43  ;;  %v2788_v28 = vld [vmem:[%s3698_s2] ss:$0 sm:$0xff]  ;;  %vm1009_vm0 = vcmask 519168  }
  0x24   : > { %v671_v43 = vld [vmem:[%s3700_s4] sm:$0x7] }
  0x26   : > { %811 = vmatpush.bf16.msra.mxu0 %v2289_v6 }
  0x8b   : > { %v539_v11 = vpop.xlane.xlu1 %538  ;;  %v535_v12 = vpop.xlane.xlu0 %534 }
  0x8c   : > { %v551_v13 = vmul.f32 %v3088_v10, %v539_v11  ;;  %v549_v14 = vmul.f32 %v3088_v10, %v535_v12  ;;  %v2293_v11 = vor.u32 %v2663_v5, %v2290_v7  ;;  %v2297_v12 = vor.u32 %v2665_v9, %v2296_v8 }
  0x8e   : > { %v3093_v15 = vsub.f32 %v3076_v0, %v551_v13  ;;  %v3096_v16 = vsub.f32 %v3078_v1, %v549_v14  ;;  %830 = vmatpush.bf16.msra.mxu1 %v2293_v11  ;;  %849 = vmatpush.bf16.msra.mxu2 %v2297_v12  ;;  %v2276_v13 = vld [vmem:[#allocation3 + $0x30] sm:$0xf]  ;;  %v2661_v14 = vld [vmem:[#allocation3 + $0x38] sm:$0xf0] }
  0x90   : > { %v559_v17 = vmul.f32 %v3093_v15, %v3093_v15  ;;  %v557_v18 = vmul.f32 %v3096_v16, %v3096_v16 }
  0x92   : > { %565 = vadd.xlane.f32.xlu0 %v559_v17  ;;  %561 = vadd.xlane.f32.xlu2 %v557_v18  ;;  %v2660_v17 = vld [vmem:[#allocation3 + $0x34] sm:$0xf]  ;;  %v2277_v18 = vor.u32 %v2661_v14, %v2276_v13 }
  0x93   : > { %v541_v19 = vpop.xlane.xlu1 %540  ;;  %v537_v20 = vpop.xlane.xlu0 %536 }
  0x94   : > { %v552_v21 = vmul.f32 %v3088_v10, %v541_v19  ;;  %v550_v22 = vmul.f32 %v3088_v10, %v537_v20  ;;  %v2278_v19 = vld [vmem:[#allocation3 + $0x3c] sm:$0xf0]  ;;  %v2284_v20 = vld [vmem:[#allocation3 + $0x38] sm:$0xf]  ;;  %812 = vmatpush.bf16.msra.mxu0 %v2277_v18 }
  0x96   : > { %v3105_v23 = vsub.f32 %v3082_v2, %v552_v21  ;;  %v3108_v24 = vsub.f32 %v3084_v3, %v550_v22  ;;  %v2662_v21 = vld [vmem:[#allocation3 + $0x40] sm:$0xf0]  ;;  %v2281_v22 = vor.u32 %v2660_v17, %v2278_v19  ;;  %v2787_v19 = vld [vmem:[%s3697_s1] ss:$0 sm:$0xff] }
  0x98   : > { %v560_v25 = vmul.f32 %v3105_v23, %v3105_v23  ;;  %v558_v26 = vmul.f32 %v3108_v24, %v3108_v24  ;;  %831 = vmatpush.bf16.msra.mxu1 %v2281_v22 }
  0x9a   : > { %567 = vadd.xlane.f32.xlu1 %v560_v25  ;;  %563 = vadd.xlane.f32.xlu2 %v558_v26  ;;  %v2285_v25 = vor.u32 %v2662_v21, %v2284_v20  ;;  %v2264_v26 = vld [vmem:[#allocation3 + $0x18] sm:$0xf] }
  0x9b   : > { %v2265_v29 = vor.u32 %v2658_v27, %v2264_v26 }
  0x9c   : > { %850 = vmatpush.bf16.msra.mxu2 %v2285_v25  ;;  %832 = vmatpush.bf16.msra.mxu1 %v2269_v34 }
  0x9d   : > { %813 = vmatpush.bf16.msra.mxu0 %v2265_v29 }
  0xa0   : > { %851 = vmatpush.bf16.msra.mxu2 %v2273_v35  ;;  %833 = vmatpush.bf16.msra.mxu1 %v2257_v45 }
  0xa1   : > { %814 = vmatpush.bf16.msra.mxu0 %v2253_v41 }
  0xa4   : > { %852 = vmatpush.bf16.msra.mxu2 %v2261_v46  ;;  %v673_v46 = vperm.slane %v671_v43, 0 }
 0x105   : > { %v562_v33 = vpop.xlane.xlu2 %561  ;;  %v566_v40 = vpop.xlane.xlu0 %565 }
 0x106   : > { %v569_v39 = vmul.f32 %v562_v33, %v3088_v10  ;;  %v571_v48 = vmul.f32 %v566_v40, %v3088_v10 }
 0x108   : > { %v573_v47 = vadd.f32 1e-06, %v569_v39  ;;  %v575_v49 = vadd.f32 1e-06, %v571_v48 }
 0x10a   : > { %2797 = vrsqrt.f32 %v573_v47  ;;  %vm583_vm2 = vweird.f32 %v573_v47  ;;  %vm603_vm9 = vweird.f32 %v575_v49 }
 0x10b   : > { %2799 = vrsqrt.f32 %v575_v49 }
 0x10d   : > { %v568_v50 = vpop.xlane.xlu1 %567  ;;  %v564_v51 = vpop.xlane.xlu2 %563 }
 0x10e   : > { %v572_v52 = vmul.f32 %v568_v50, %v3088_v10  ;;  %v570_v53 = vmul.f32 %v564_v51, %v3088_v10 }
 0x110   : > { %v2798_v54 = vpop.eup %2797  ;;  %v576_v55 = vadd.f32 1e-06, %v572_v52  ;;  %v574_v56 = vadd.f32 1e-06, %v570_v53 }
 0x111   : > { %v578_v57 = vmul.f32 %v2798_v54, %v573_v47  ;;  %v2800_v60 = vpop.eup %2799  ;;  %vm584_vm1 = vweird.f32 %v2798_v54  ;;  %v674_v47 = vperm.slane %v671_v43, 1 }
 0x112   : > { %2801 = vrsqrt.f32 %v576_v55  ;;  %v598_v6 = vmul.f32 %v2800_v60, %v575_v49  ;;  %vm585_vm3 = vmor %vm583_vm2, %vm584_vm1  ;;  %vm593_vm5 = vweird.f32 %v574_v56  ;;  %vm613_vm7 = vweird.f32 %v576_v55 }
 0x113   : > { %v579_v58 = vmul.f32 %v2798_v54, %v578_v57  ;;  %2803 = vrsqrt.f32 %v574_v56  ;;  %vm604_vm10 = vweird.f32 %v2800_v60  ;;  %vm1160_vm1 = vcmask 1043968  }
 0x114   : > { %v599_v12 = vmul.f32 %v2800_v60, %v598_v6  ;;  %vm605_vm12 = vmor %vm603_vm9, %vm604_vm10 }
 0x115   : > { %v580_v59 = vmul.f32 0.5, %v579_v58 }
 0x116   : > { %v600_v20 = vmul.f32 0.5, %v599_v12 }
 0x117   : > { %v581_v61 = vsub.f32 1.5, %v580_v59 }
 0x118   : > { %v2802_v62 = vpop.eup %2801  ;;  %v601_v29 = vsub.f32 1.5, %v600_v20 }
 0x119   : > { %v2804_v63 = vpop.eup %2803  ;;  %v608_v4 = vmul.f32 %v2802_v62, %v576_v55  ;;  %v582_v5 = vmul.f32 %v2798_v54, %v581_v61  ;;  %vm614_vm8 = vweird.f32 %v2802_v62 }
 0x11a   : > { %v588_v7 = vmul.f32 %v2804_v63, %v574_v56  ;;  %vm594_vm4 = vweird.f32 %v2804_v63  ;;  %vm615_vm11 = vmor %vm613_vm7, %vm614_vm8  ;;  %v602_v33 = vmul.f32 %v2800_v60, %v601_v29 }
 0x11b   : > { %v609_v8 = vmul.f32 %v2802_v62, %v608_v4  ;;  %v586_v11 = vsel %vm585_vm3, %v2798_v54, %v582_v5  ;;  %vm595_vm6 = vmor %vm593_vm5, %vm594_vm4 }
 0x11c   : > { %v589_v9 = vmul.f32 %v2804_v63, %v588_v7  ;;  %v617_v18 = vmul.f32 %v586_v11, %v3096_v16 }
 0x11d   : > { %v610_v14 = vmul.f32 0.5, %v609_v8 }
 0x11e   : > { %v590_v13 = vmul.f32 0.5, %v589_v9  ;;  %v625_v27 = vmul.f32 %v2787_v19, %v617_v18 }
 0x11f   : > { %v611_v22 = vsub.f32 1.5, %v610_v14 }
 0x120   : > { %v591_v17 = vsub.f32 1.5, %v590_v13  ;;  %v633_v31 = vadd.f32 %v2788_v28, %v625_v27  ;;  %v675_v13 = vperm.slane %v671_v43, 2 }
 0x121   : > { %v612_v30 = vmul.f32 %v2802_v62, %v611_v22 }
 0x122   : > { %v592_v21 = vmul.f32 %v2804_v63, %v591_v17 }
 0x123   : > { %v616_v35 = vsel %vm615_vm11, %v2802_v62, %v612_v30 }
 0x124   : > { %v596_v25 = vsel %vm595_vm6, %v2804_v63, %v592_v21  ;;  %v620_v36 = vmul.f32 %v616_v35, %v3105_v23 }
 0x125   : > { %v618_v26 = vmul.f32 %v596_v25, %v3108_v24  ;;  %v606_v24 = vsel %vm605_vm12, %v2800_v60, %v602_v33 }
 0x126   : > { %v619_v37 = vmul.f32 %v606_v24, %v3093_v15  ;;  %v628_v38 = vmul.f32 %v2787_v19, %v620_v36 }
 0x127   : > { %v626_v16 = vmul.f32 %v2787_v19, %v618_v26 }
 0x128   : > { %v627_v39 = vmul.f32 %v2787_v19, %v619_v37  ;;  %v636_v40 = vadd.f32 %v2788_v28, %v628_v38 }
 0x129   : > { %v634_v32 = vadd.f32 %v2788_v28, %v626_v16 }
 0x12a   : > { %v635_v41 = vadd.f32 %v2788_v28, %v627_v39 }
 0x12b   : > { %v637_v34 = vpack.c.bf16 %v634_v32, %v633_v31 }
 0x12c   : > { %v638_v42 = vpack.c.bf16 %v636_v40, %v635_v41 }
 0x12d   : > { %815 = vmatmul.bf16.vlgmr.msra.gmra.mxu0 %v637_v34  ;;  %834 = vmatmul.bf16.vlgmr.msra.gmra.mxu1 %v637_v34 }
 0x12e   : > { %853 = vmatmul.bf16.vlgmr.msra.gmra.mxu2 %v637_v34 }
 0x13d   : > { %820 = vmatmul.bf16.gmra.mxu0 %v638_v42  ;;  %839 = vmatmul.bf16.gmra.mxu1 %v638_v42 }
 0x13e   : > { %858 = vmatmul.bf16.gmra.mxu2 %v638_v42 }
 0x1aa   : > { %v816_v44 = vpop.f32.mrf.mxu0  ;;  %v835_v45 = vpop.f32.mrf.mxu1 }
 0x1ab   : > { %v817_v48 = vadd.f32 %v816_v44, %v673_v46  ;;  %v836_v23 = vadd.f32 %v835_v45, %v674_v47 }
 0x1ad   : > { %v864_v51 = vpack.c.bf16 %v836_v23, %v817_v48 }
 0x1af   : > { %v972_v55 = vunpack.c.h.b16 %v864_v51  ;;  %v879_v62 = vunpack.c.l.b16 %v864_v51 }
 0x1b1   : > { %v854_v49 = vpop.f32.mrf.mxu2 }
 0x1b2   : > { %v818_v15 = vpop.f32.mrf.mxu0  ;;  %v837_v50 = vpop.f32.mrf.mxu1  ;;  %v855_v16 = vadd.f32 %v854_v49, %v675_v13 }
 0x1b3   : > { %v819_v52 = vadd.f32 %v818_v15, %v673_v46  ;;  %v838_v53 = vadd.f32 %v837_v50, %v674_v47 }
 0x1b4   : > { %v865_v34 = vpack.c.bf16 %v855_v16, %v855_v16 }
 0x1b5   : > { %v866_v54 = vpack.c.bf16 %v838_v53, %v819_v52 }
 0x1b6   : > { %v1022_v37 = vunpack.c.l.b16 %v865_v34 }
 0x1b7   : > { %v973_v56 = vunpack.c.h.b16 %v866_v54  ;;  %v880_v61 = vunpack.c.l.b16 %v866_v54 }
 0x1b9   : > { %v856_v57 = vpop.f32.mrf.mxu2  ;;  %v976_v58 = vpack.c.b16 %v973_v56, %v972_v55  ;;  %v883_v6 = vpack.c.b16 %v880_v61, %v879_v62 }
 0x1ba   : > { %v821_v59 = vpop.f32.mrf.mxu0  ;;  %v840_v60 = vpop.f32.mrf.mxu1  ;;  %v857_v27 = vadd.f32 %v856_v57, %v675_v13 }
 0x1bb   : > { %1014 = vrot.lane.b32.xlu2 %v976_v58, %s2960_s17  ;;  %v822_v63 = vadd.f32 %v821_v59, %v673_v46  ;;  %v841_v4 = vadd.f32 %v840_v60, %v674_v47 }
 0x1bc   : > { %v867_v31 = vpack.c.bf16 %v857_v27, %v857_v27 }
 0x1bd   : > { %v868_v9 = vpack.c.bf16 %v841_v4, %v822_v63 }
 0x1be   : > { %v1023_v24 = vunpack.c.l.b16 %v867_v31 }
 0x1bf   : > { %v881_v18 = vunpack.c.l.b16 %v868_v9  ;;  %v974_v19 = vunpack.c.h.b16 %v868_v9 }
 0x1c0   : > { %v3136_v38 = vpack.c.b16 %v1023_v24, %v1022_v37 }
 0x1c1   : > { %v859_v5 = vpop.f32.mrf.mxu2 }
 0x1c2   : > { %v823_v7 = vpop.f32.mrf.mxu0  ;;  %v842_v8 = vpop.f32.mrf.mxu1  ;;  %v860_v17 = vadd.f32 %v859_v5, %v675_v13  ;;  %v1035_v39 = vsel %vm889_vm13, %v3136_v38, 0 }
 0x1c3   : > { %v824_v11 = vadd.f32 %v823_v7, %v673_v46  ;;  %v843_v12 = vadd.f32 %v842_v8, %v674_v47  ;;  %885 = vrot.lane.b32.xlu2 %v883_v6, %s2960_s17  ;;  %v872_v46 = vlaneseq }
 0x1c4   : > { %v869_v28 = vpack.c.bf16 %v860_v17, %v860_v17 }
 0x1c5   : > { %v870_v14 = vpack.c.bf16 %v843_v12, %v824_v11  ;;  %v873_v47 = vand.u32 127, %v872_v46 }
 0x1c6   : > { %v1024_v32 = vunpack.c.l.b16 %v869_v28 }
 0x1c7   : > { %v882_v20 = vunpack.c.l.b16 %v870_v14  ;;  %v975_v21 = vunpack.c.h.b16 %v870_v14  ;;  %vm874_vm14 = vcmp.lt.s32.totalorder %v873_v47, 17 }
 0x1c9   : > { %v861_v22 = vpop.f32.mrf.mxu2  ;;  %v977_v25 = vpack.c.b16 %v975_v21, %v974_v19  ;;  %v884_v26 = vpack.c.b16 %v882_v20, %v881_v18 }
 0x1ca   : > { %v862_v29 = vadd.f32 %v861_v22, %v675_v13 }
 0x1cb   : > { %1016 = vrot.lane.b32.xlu1 %v977_v25, %s2960_s17  ;;  %887 = vrot.lane.b32.xlu0 %v884_v26, %s2960_s17 }
 0x1cc   : > { %v871_v30 = vpack.c.bf16 %v862_v29, %v862_v29 }
 0x1ce   : > { %v1025_v33 = vunpack.c.l.b16 %v871_v30 }
 0x1d0   : > { %v1027_v35 = vpack.c.b16 %v1025_v33, %v1024_v32 }
 0x1d2   : > { %v1038_v36 = vsel %vm889_vm13, %v1027_v35, 0 }
 0x1d3   : > { %1046 = vmatpush.bf16.xpose.msrb.mxu0 %v1038_v36 }
 0x1db   : > { %1047 = vmatpush.bf16.xpose.msrb.mxu0 %v1035_v39 }
 0x215   : > { %v1015_v40 = vpop.permute.xlu2 %1014 }
 0x216   : > { %2350 = vmatmul.msk.bf16.vlgmr.msrb.gmra.mxu0 %vm889_vm13, %v1015_v40 }
 0x21d   : > { %v886_v44 = vpop.permute.xlu2 %885 }
 0x21e   : > { %v897_v45 = vsel %vm889_vm13, %v886_v44, 0 }
 0x23d   : > { %v1017_v41 = vpop.permute.xlu1 %1016  ;;  %v888_v42 = vpop.permute.xlu0 %887 }
 0x23e   : > { %2351 = vmatmul.msk.bf16.gmra.mxu0 %vm889_vm13, %v1017_v41  ;;  %v900_v43 = vsel %vm889_vm13, %v888_v42, 0 }
 0x23f   : > { %908 = vmatpush.bf16.xpose.msra.mxu3 %v900_v43 }
 0x247   : > { %909 = vmatpush.bf16.xpose.msra.mxu3 %v897_v45 }
 0x24e   : > { %2346 = vmatmul.msk.bf16.vlgmr.msra.gmra.mxu3 %vm889_vm13, %v883_v6 }
 0x24f   : > { %992 = vmatpush.bf16.msrb.mxu3 %v977_v25 }
 0x253   : > { %993 = vmatpush.bf16.msrb.mxu3 %v976_v58 }
 0x25e   : > { %2347 = vmatmul.msk.bf16.gmra.mxu3 %vm889_vm13, %v884_v26 }
 0x293   : > { %v1049_v48 = vpop.f32.mrf.mxu0 }
 0x294   : > { %v1059_v23 = vsel %vm874_vm14, %v1049_v48, -1e+30 }
 0x295   : > { %v1063_v49 = vsel %vm925_vm15, %v1059_v23, -inf }
 0x296   : > { %1064 = vmax.xlane.f32.xlu0 %v1063_v49 }
 0x29b   : > { %v1051_v15 = vpop.f32.mrf.mxu0 }
 0x29c   : > { %v1060_v50 = vsel %vm874_vm14, %v1051_v15, -1e+30 }
 0x29d   : > { %v1066_v51 = vsel %vm925_vm15, %v1060_v50, -inf }
 0x29e   : > { %1067 = vmax.xlane.f32.xlu2 %v1066_v51 }
 0x2bb   : > { %v1054_v52 = vpop.f32.mrf.mxu0 }
 0x2bc   : > { %v1061_v53 = vsel %vm874_vm14, %v1054_v52, -1e+30 }
 0x2bd   : > { %v1069_v54 = vsel %vm925_vm15, %v1061_v53, -inf }
 0x2be   : > { %1070 = vmax.xlane.f32.xlu1 %v1069_v54 }
 0x2c3   : > { %v1056_v55 = vpop.f32.mrf.mxu0 }
 0x2c4   : > { %v1062_v56 = vsel %vm874_vm14, %v1056_v55, -1e+30 }
 0x2c5   : > { %v1072_v57 = vsel %vm925_vm15, %v1062_v56, -inf }
 0x2c6   : > { %1073 = vmax.xlane.f32.xlu0 %v1072_v57 }
 0x2d1   : > { %v911_v58 = vpop.f32.mrf.mxu3 }
 0x2d2   : > { %v921_v59 = vsel %vm874_vm14, %v911_v58, -1e+30 }
 0x2d3   : > { %v926_v60 = vsel %vm925_vm15, %v921_v59, -inf }
 0x2d4   : > { %927 = vmax.xlane.f32.xlu2 %v926_v60 }
 0x2d9   : > { %v913_v61 = vpop.f32.mrf.mxu3 }
 0x2da   : > { %v922_v62 = vsel %vm874_vm14, %v913_v61, -1e+30 }
 0x2db   : > { %v929_v63 = vsel %vm925_vm15, %v922_v62, -inf }
 0x2dc   : > { %930 = vmax.xlane.f32.xlu1 %v929_v63 }
 0x2e1   : > { %v916_v4 = vpop.f32.mrf.mxu3 }
 0x2e2   : > { %v923_v5 = vsel %vm874_vm14, %v916_v4, -1e+30 }
 0x2e3   : > { %v932_v6 = vsel %vm925_vm15, %v923_v5, -inf }
 0x2e4   : > { %933 = vmax.xlane.f32.xlu0 %v932_v6 }
 0x2e9   : > { %v918_v7 = vpop.f32.mrf.mxu3 }
 0x2ea   : > { %v924_v8 = vsel %vm874_vm14, %v918_v7, -1e+30 }
 0x2eb   : > { %v935_v9 = vsel %vm925_vm15, %v924_v8, -inf }
 0x2ec   : > { %936 = vmax.xlane.f32.xlu2 %v935_v9 }
 0x304   : > { %1111 = vrot.lane.b32.xlu2 %v1027_v35, %s2960_s17 }
 0x309   : > { %v1065_v11 = vpop.xlane.xlu0 %1064 }
 0x30a   : > { %v1075_v12 = vsub.f32 %v1059_v23, %v1065_v11 }
 0x30c   : > { %v1079_v13 = vmul.f32 1.442695, %v1075_v12 }
 0x30e   : > { %2805 = vpow2.f32 %v1079_v13 }
 0x311   : > { %v1068_v14 = vpop.xlane.xlu2 %1067 }
 0x312   : > { %v1076_v17 = vsub.f32 %v1060_v50, %v1068_v14 }
 0x314   : > { %v2806_v18 = vpop.eup %2805  ;;  %v1081_v19 = vmul.f32 1.442695, %v1076_v17 }
 0x315   : > { %v1087_v20 = vsel %vm925_vm15, %v2806_v18, 0.0 }
 0x316   : > { %2807 = vpow2.f32 %v1081_v19  ;;  %1088 = vadd.xlane.f32.xlu1 %v1087_v20 }
 0x31c   : > { %v2808_v21 = vpop.eup %2807 }
 0x31d   : > { %v1090_v22 = vsel %vm925_vm15, %v2808_v21, 0.0 }
 0x31e   : > { %1091 = vadd.xlane.f32.xlu0 %v1090_v22 }
 0x32f   : > { %1109 = vrot.lane.b32.xlu1 %v3136_v38, %s2960_s17 }
 0x331   : > { %v1071_v25 = vpop.xlane.xlu1 %1070 }
 0x332   : > { %v1077_v26 = vsub.f32 %v1061_v53, %v1071_v25 }
 0x334   : > { %v1083_v27 = vmul.f32 1.442695, %v1077_v26 }
 0x336   : > { %2809 = vpow2.f32 %v1083_v27 }
 0x339   : > { %v1074_v28 = vpop.xlane.xlu0 %1073 }
 0x33a   : > { %v1078_v29 = vsub.f32 %v1062_v56, %v1074_v28 }
 0x33c   : > { %v2810_v16 = vpop.eup %2809  ;;  %v1085_v30 = vmul.f32 1.442695, %v1078_v29 }
 0x33d   : > { %v1093_v31 = vsel %vm925_vm15, %v2810_v16, 0.0 }
 0x33e   : > { %2811 = vpow2.f32 %v1085_v30  ;;  %1094 = vadd.xlane.f32.xlu0 %v1093_v31 }
 0x344   : > { %v2812_v32 = vpop.eup %2811 }
 0x345   : > { %v1096_v33 = vsel %vm925_vm15, %v2812_v32, 0.0 }
 0x346   : > { %1097 = vadd.xlane.f32.xlu0 %v1096_v33  ;;  %v2687_v33 = vld [vmem:[#allocation5 + $0x38] sm:$0xff] }
 0x347   : > { %v928_v34 = vpop.xlane.xlu2 %927  ;;  %1249 = vmatpush.bf16.msrb.mxu2 %v2687_v33 }
 0x348   : > { %v938_v35 = vsub.f32 %v921_v59, %v928_v34  ;;  %v2686_v34 = vld [vmem:[#allocation5 + $0x30] sm:$0xff] }
 0x34a   : > { %v942_v24 = vmul.f32 1.442695, %v938_v35 }
 0x34b   : > { %1250 = vmatpush.bf16.msrb.mxu2 %v2686_v34 }
 0x34c   : > { %2813 = vpow2.f32 %v942_v24 }
 0x34f   : > { %v931_v36 = vpop.xlane.xlu1 %930 }
 0x350   : > { %v939_v37 = vsub.f32 %v922_v62, %v931_v36  ;;  %v2685_v36 = vld [vmem:[#allocation5 + $0x28] sm:$0xff] }
 0x351   : > { %1251 = vmatpush.bf16.msrb.mxu2 %v2685_v36 }
 0x352   : > { %v2814_v38 = vpop.eup %2813  ;;  %v944_v39 = vmul.f32 1.442695, %v939_v37  ;;  %v2684_v37 = vld [vmem:[#allocation5 + $0x20] sm:$0xff] }
 0x353   : > { %v950_v40 = vsel %vm925_vm15, %v2814_v38, 0.0 }
 0x354   : > { %2815 = vpow2.f32 %v944_v39  ;;  %951 = vadd.xlane.f32.xlu0 %v950_v40 }
 0x355   : > { %1252 = vmatpush.bf16.msrb.mxu2 %v2684_v37  ;;  %v2492_v37 = vld [vmem:[%s3706_s10 + $0xc0] sm:$0xf] }
 0x357   : > { %v934_v41 = vpop.xlane.xlu0 %933 }
 0x358   : > { %v940_v42 = vsub.f32 %v923_v5, %v934_v41 }
 0x35a   : > { %v2816_v43 = vpop.eup %2815  ;;  %v946_v44 = vmul.f32 1.442695, %v940_v42 }
 0x35b   : > { %v953_v45 = vsel %vm925_vm15, %v2816_v43, 0.0 }
 0x35c   : > { %2817 = vpow2.f32 %v946_v44  ;;  %954 = vadd.xlane.f32.xlu2 %v953_v45  ;;  %v2683_v44 = vld [vmem:[#allocation5 + $0x18] sm:$0xff]  ;;  %v2682_v45 = vld [vmem:[#allocation5 + $0x10] sm:$0xff] }
 0x35d   : > { %1253 = vmatpush.bf16.msrb.mxu2 %v2683_v44 }
 0x35f   : > { %v937_v46 = vpop.xlane.xlu2 %936 }
 0x360   : > { %v941_v47 = vsub.f32 %v924_v8, %v937_v46  ;;  %v2681_v46 = vld [vmem:[#allocation5 + $0x8] sm:$0xff] }
 0x361   : > { %1254 = vmatpush.bf16.msrb.mxu2 %v2682_v45 }
 0x362   : > { %v2818_v48 = vpop.eup %2817  ;;  %v948_v23 = vmul.f32 1.442695, %v941_v47  ;;  %v2680_v47 = vld [vmem:[#allocation5] sm:$0xff] }
 0x363   : > { %v956_v49 = vsel %vm925_vm15, %v2818_v48, 0.0 }
 0x364   : > { %2819 = vpow2.f32 %v948_v23  ;;  %957 = vadd.xlane.f32.xlu1 %v956_v49 }
 0x365   : > { %1255 = vmatpush.bf16.msrb.mxu2 %v2681_v46  ;;  %v2713_v46 = vld [vmem:[%s3706_s10 + $0xcc] sm:$0xf] }
 0x367   : > { %v1112_v15 = vpop.permute.xlu2 %1111 }
 0x368   : > { %1127 = vmatpush.bf16.msrb.mxu1 %v1112_v15 }
 0x369   : > { %1256 = vmatpush.bf16.msrb.mxu2 %v2680_v47  ;;  %v2502_v47 = vld [vmem:[%s3706_s10 + $0xd8] sm:$0xf0] }
 0x36a   : > { %v2820_v50 = vpop.eup %2819 }
 0x36b   : > { %v959_v51 = vsel %vm925_vm15, %v2820_v50, 0.0 }
 0x36c   : > { %960 = vadd.xlane.f32.xlu0 %v959_v51 }
 0x389   : > { %v1089_v53 = vpop.xlane.xlu1 %1088 }
 0x391   : > { %v1092_v52 = vpop.xlane.xlu0 %1091 }
 0x392   : > { %2821 = vrcp.f32 %v1092_v52  ;;  %v2789_v52 = vld [vmem:[%s3702_s6] ss:$0 sm:$0xff] }
 0x393   : > { %2823 = vrcp.f32 %v1089_v53  ;;  %v2790_v53 = vld [vmem:[%s3703_s7] ss:$0 sm:$0xff] }
 0x398   : > { %v2822_v54 = vpop.eup %2821 }
 0x399   : > { %v2824_v55 = vpop.eup %2823  ;;  %v1104_v56 = vmul.f32 %v2822_v54, %v2808_v21 }
 0x39a   : > { %v1103_v57 = vmul.f32 %v2824_v55, %v2806_v18 }
 0x39c   : > { %v1107_v59 = vpack.c.bf16 %v1104_v56, %v1103_v57 }
 0x3a1   : > { %v1110_v58 = vpop.permute.xlu1 %1109 }
 0x3a2   : > { %1128 = vmatpush.bf16.msrb.mxu1 %v1110_v58 }
 0x3a5   : > { %2352 = vmatmul.msk.bf16.vlgmr.msrb.gmra.mxu1 %vm925_vm15, %v1107_v59 }
 0x3b1   : > { %v1095_v60 = vpop.xlane.xlu0 %1094 }
 0x3b2   : > { %2825 = vrcp.f32 %v1095_v60 }
 0x3b8   : > { %v2826_v62 = vpop.eup %2825 }
 0x3b9   : > { %v1098_v61 = vpop.xlane.xlu0 %1097  ;;  %v1105_v4 = vmul.f32 %v2826_v62, %v2810_v16 }
 0x3ba   : > { %2827 = vrcp.f32 %v1098_v61 }
 0x3c0   : > { %v2828_v63 = vpop.eup %2827 }
 0x3c1   : > { %v1106_v5 = vmul.f32 %v2828_v63, %v2812_v32 }
 0x3c3   : > { %v1108_v6 = vpack.c.bf16 %v1106_v5, %v1105_v4 }
 0x3c5   : > { %2353 = vmatmul.msk.bf16.gmra.mxu1 %vm925_vm15, %v1108_v6 }
 0x3c7   : > { %v952_v7 = vpop.xlane.xlu0 %951 }
 0x3c8   : > { %2829 = vrcp.f32 %v952_v7 }
 0x3ce   : > { %v2830_v9 = vpop.eup %2829 }
 0x3cf   : > { %v955_v8 = vpop.xlane.xlu2 %954  ;;  %v966_v12 = vmul.f32 %v2830_v9, %v2814_v38 }
 0x3d0   : > { %2831 = vrcp.f32 %v955_v8 }
 0x3d6   : > { %v2832_v11 = vpop.eup %2831 }
 0x3d7   : > { %v967_v13 = vmul.f32 %v2832_v11, %v2816_v43  ;;  %v958_v17 = vpop.xlane.xlu1 %957 }
 0x3d8   : > { %2833 = vrcp.f32 %v958_v17 }
 0x3d9   : > { %v970_v14 = vpack.c.bf16 %v967_v13, %v966_v12 }
 0x3db   : > { %2348 = vmatmul.msk.bf16.vlgmr.msrb.gmra.mxu3 %vm925_vm15, %v970_v14 }
 0x3de   : > { %v2834_v19 = vpop.eup %2833 }
 0x3df   : > { %v961_v18 = vpop.xlane.xlu0 %960  ;;  %v968_v21 = vmul.f32 %v2834_v19, %v2818_v48 }
 0x3e0   : > { %2835 = vrcp.f32 %v961_v18 }
 0x3e6   : > { %v2836_v20 = vpop.eup %2835 }
 0x3e7   : > { %v969_v22 = vmul.f32 %v2836_v20, %v2820_v50 }
 0x3e9   : > { %v971_v25 = vpack.c.bf16 %v969_v22, %v968_v21 }
 0x3eb   : > { %2349 = vmatmul.msk.bf16.gmra.mxu3 %vm925_vm15, %v971_v25 }
 0x422   : > { %v1130_v26 = vpop.f32.mrf.mxu1 }
 0x423   : > { %v1140_v27 = vpack.c.bf16 %v1130_v26, %v1130_v26 }
 0x425   : > { %1148 = vrot.lane.b32.xlu0 %v1140_v27, %s2960_s17  ;;  %v2508_v27 = vld [vmem:[%s3706_s10 + $0xe0] sm:$0xf] }
 0x42a   : > { %v1132_v28 = vpop.f32.mrf.mxu1 }
 0x42b   : > { %v1141_v29 = vpack.c.bf16 %v1132_v28, %v1132_v28  ;;  %v2718_v28 = vld [vmem:[%s3706_s10 + $0xec] sm:$0xf0] }
 0x42d   : > { %1150 = vrot.lane.b32.xlu0 %v1141_v29, %s2960_s17  ;;  %v2716_v29 = vld [vmem:[%s3706_s10 + $0xe4] sm:$0xf] }
 0x442   : > { %v1135_v16 = vpop.f32.mrf.mxu1 }
 0x443   : > { %v1142_v30 = vpack.c.bf16 %v1135_v16, %v1135_v16  ;;  %v2509_v16 = vor.u32 %v2718_v28, %v2508_v27 }
 0x445   : > { %1152 = vrot.lane.b32.xlu0 %v1142_v30, %s2960_s17  ;;  %v2510_v30 = vld [vmem:[%s3706_s10 + $0xf0] sm:$0xf0]  ;;  %1580 = vmatpush.bf16.msra.mxu3 %v2509_v16  ;;  %v2454_v16 = vld [vmem:[%s3706_s10 + $0x78] sm:$0xf0] }
 0x446   : > { %v2513_v33 = vor.u32 %v2716_v29, %v2510_v30  ;;  %v2701_v29 = vld [vmem:[%s3706_s10 + $0x6c] sm:$0xf] }
 0x447   : > { %v2457_v30 = vor.u32 %v2701_v29, %v2454_v16 }
 0x448   : > { %1599 = vmatpush.bf16.msra.mxu0 %v2513_v33  ;;  %v2696_v33 = vld [vmem:[%s3706_s10 + $0x44] sm:$0xf] }
 0x44a   : > { %v1137_v31 = vpop.f32.mrf.mxu1 }
 0x44b   : > { %v1143_v32 = vpack.c.bf16 %v1137_v31, %v1137_v31  ;;  %v2516_v31 = vld [vmem:[%s3706_s10 + $0xe8] sm:$0xf] }
 0x44d   : > { %1154 = vrot.lane.b32.xlu2 %v1143_v32, %s2960_s17  ;;  %v2719_v32 = vld [vmem:[%s3706_s10 + $0xf4] sm:$0xf0] }
 0x44e   : > { %v2517_v34 = vor.u32 %v2719_v32, %v2516_v31  ;;  %v2428_v31 = vld [vmem:[%s3706_s10 + $0x40] sm:$0xf]  ;;  %v2698_v32 = vld [vmem:[%s3706_s10 + $0x4c] sm:$0xf0] }
 0x450   : > { %1618 = vmatpush.bf16.msra.mxu1 %v2517_v34  ;;  %v2429_v34 = vor.u32 %v2698_v32, %v2428_v31 }
 0x45e   : > { %v995_v35 = vpop.f32.mrf.mxu3 }
 0x45f   : > { %v1005_v24 = vpack.c.bf16 %v995_v35, %v995_v35  ;;  %v2717_v35 = vld [vmem:[%s3706_s10 + $0xec] sm:$0xf] }
 0x461   : > { %1010 = vst.msk [vmem:[#allocation2] sm:$0xf] %vm1009_vm0, %v1005_v24  ;;  %v2518_v24 = vld [vmem:[%s3706_s10 + $0xf8] sm:$0xf0] }
 0x462   : > { %v2521_v36 = vor.u32 %v2717_v35, %v2518_v24  ;;  %v2430_v35 = vld [vmem:[%s3706_s10 + $0x50] sm:$0xf0]  ;;  %v2436_v24 = vld [vmem:[%s3706_s10 + $0x48] sm:$0xf] }
 0x464   : > { %1637 = vmatpush.bf16.msra.mxu2 %v2521_v36  ;;  %v2699_v36 = vld [vmem:[%s3706_s10 + $0x54] sm:$0xf0] }
 0x466   : > { %v997_v38 = vpop.f32.mrf.mxu3 }
 0x467   : > { %v1006_v39 = vpack.c.bf16 %v997_v38, %v997_v38  ;;  %v2714_v38 = vld [vmem:[%s3706_s10 + $0xcc] sm:$0xf0] }
 0x469   : > { %1011 = vst.msk [vmem:[#allocation2 + $0x4] sm:$0xf] %vm1009_vm0, %v1006_v39  ;;  %v2712_v39 = vld [vmem:[%s3706_s10 + $0xc4] sm:$0xf] }
 0x46e   : > { %v1000_v40 = vpop.f32.mrf.mxu3 }
 0x46f   : > { %v1007_v41 = vpack.c.bf16 %v1000_v40, %v1000_v40  ;;  %v2493_v40 = vor.u32 %v2714_v38, %v2492_v37  ;;  %v2433_v37 = vor.u32 %v2696_v33, %v2430_v35  ;;  %v2437_v38 = vor.u32 %v2699_v36, %v2436_v24 }
 0x471   : > { %1012 = vst.msk [vmem:[#allocation2 + $0x8] sm:$0xf] %vm1009_vm0, %v1007_v41  ;;  %v2494_v41 = vld [vmem:[%s3706_s10 + $0xd0] sm:$0xf0]  ;;  %1581 = vmatpush.bf16.msra.mxu3 %v2493_v40  ;;  %v2438_v40 = vld [vmem:[%s3706_s10 + $0x58] sm:$0xf0] }
 0x472   : > { %v2497_v44 = vor.u32 %v2712_v39, %v2494_v41  ;;  %v2697_v39 = vld [vmem:[%s3706_s10 + $0x4c] sm:$0xf] }
 0x473   : > { %v2441_v41 = vor.u32 %v2697_v39, %v2438_v40 }
 0x474   : > { %1600 = vmatpush.bf16.msra.mxu0 %v2497_v44  ;;  %v2692_v44 = vld [vmem:[%s3706_s10 + $0x24] sm:$0xf] }
 0x476   : > { %v1002_v42 = vpop.f32.mrf.mxu3 }
 0x477   : > { %v1008_v43 = vpack.c.bf16 %v1002_v42, %v1002_v42  ;;  %v2500_v42 = vld [vmem:[%s3706_s10 + $0xc8] sm:$0xf] }
 0x479   : > { %1013 = vst.msk [vmem:[#allocation2 + $0xc] sm:$0xf] %vm1009_vm0, %v1008_v43  ;;  %v2715_v43 = vld [vmem:[%s3706_s10 + $0xd4] sm:$0xf0] }
 0x47a   : > { %v2501_v45 = vor.u32 %v2715_v43, %v2500_v42  ;;  %v2412_v42 = vld [vmem:[%s3706_s10 + $0x20] sm:$0xf]  ;;  %v2694_v43 = vld [vmem:[%s3706_s10 + $0x2c] sm:$0xf0] }
 0x47c   : > { %1619 = vmatpush.bf16.msra.mxu1 %v2501_v45  ;;  %v2413_v45 = vor.u32 %v2694_v43, %v2412_v42 }
 0x497   : > { %v1149_v48 = vpop.permute.xlu0 %1148 }
 0x498   : > { %1161 = vst.msk [vmem:[#allocation2] sm:$0xf] %vm1160_vm1, %v1149_v48  ;;  %v2505_v48 = vor.u32 %v2713_v46, %v2502_v47  ;;  %v2414_v46 = vld [vmem:[%s3706_s10 + $0x30] sm:$0xf0]  ;;  %v2420_v47 = vld [vmem:[%s3706_s10 + $0x28] sm:$0xf] }
 0x49a   : > { %1638 = vmatpush.bf16.msra.mxu2 %v2505_v48  ;;  %v2695_v48 = vld [vmem:[%s3706_s10 + $0x34] sm:$0xf0] }
 0x49f   : > { %v1151_v23 = vpop.permute.xlu0 %1150 }
 0x4a0   : > { %1162 = vst.msk [vmem:[#allocation2 + $0x4] sm:$0xf] %vm1160_vm1, %v1151_v23  ;;  %v2476_v23 = vld [vmem:[%s3706_s10 + $0xa0] sm:$0xf] }
 0x4a7   : > { %v1155_v49 = vpop.permute.xlu2 %1154  ;;  %v2678_v15 = vld [vmem:[#allocation2] sm:$0xff] }
 0x4a8   : > { %1164 = vst.msk [vmem:[#allocation2 + $0xc] sm:$0xf] %vm1160_vm1, %v1155_v49  ;;  %1257 = vmatmul.bf16.vlgmr.msrb.gmra.mxu2 %v2678_v15  ;;  %v2710_v49 = vld [vmem:[%s3706_s10 + $0xac] sm:$0xf0]  ;;  %v2708_v15 = vld [vmem:[%s3706_s10 + $0xa4] sm:$0xf] }
 0x4b7   : > { %v1153_v50 = vpop.permute.xlu0 %1152 }
 0x4b8   : > { %1163 = vst.msk [vmem:[#allocation2 + $0x8] sm:$0xf] %vm1160_vm1, %v1153_v50  ;;  %v2477_v50 = vor.u32 %v2710_v49, %v2476_v23  ;;  %v2417_v49 = vor.u32 %v2692_v44, %v2414_v46 }
 0x4ba   : > { %1582 = vmatpush.bf16.msra.mxu3 %v2477_v50  ;;  %v2693_v50 = vld [vmem:[%s3706_s10 + $0x2c] sm:$0xf] }
 0x4bf   : > { %v2679_v51 = vld [vmem:[#allocation2 + $0x8] sm:$0xff] }
 0x4c0   : > { %1262 = vmatmul.bf16.gmra.mxu2 %v2679_v51  ;;  %v2478_v51 = vld [vmem:[%s3706_s10 + $0xb0] sm:$0xf0] }
 0x52b   : > { %v1258_v54 = vpop.f32.mrf.mxu2 }
 0x52c   : > { %v1259_v55 = vadd.f32 %v2789_v52, %v1258_v54  ;;  %v2481_v54 = vor.u32 %v2708_v15, %v2478_v51  ;;  %v2421_v15 = vor.u32 %v2695_v48, %v2420_v47  ;;  %v2422_v51 = vld [vmem:[%s3706_s10 + $0x38] sm:$0xf0] }
 0x52e   : > { %v1272_v56 = vmul.f32 %v2790_v53, %v1259_v55  ;;  %1601 = vmatpush.bf16.msra.mxu0 %v2481_v54  ;;  %v2396_v54 = vld [vmem:[%s3706_s10] sm:$0xf] }
 0x530   : > { %v3192_v57 = vadd.f32 %v1272_v56, %v3078_v1  ;;  %v2709_v56 = vld [vmem:[%s3706_s10 + $0xac] sm:$0xf] }
 0x532   : > { %1280 = vadd.xlane.f32.xlu1 %v3192_v57 }
 0x533   : > { %v1260_v58 = vpop.f32.mrf.mxu2 }
 0x534   : > { %v1261_v59 = vadd.f32 %v2789_v52, %v1260_v58  ;;  %v2486_v58 = vld [vmem:[%s3706_s10 + $0xb8] sm:$0xf0] }
 0x536   : > { %v1273_v60 = vmul.f32 %v2790_v53, %v1261_v59  ;;  %v2489_v59 = vor.u32 %v2709_v56, %v2486_v58  ;;  %v2688_v56 = vld [vmem:[%s3706_s10 + $0x4] sm:$0xf] }
 0x538   : > { %v3196_v61 = vadd.f32 %v1273_v60, %v3084_v3  ;;  %v2460_v60 = vld [vmem:[%s3706_s10 + $0x80] sm:$0xf]  ;;  %1639 = vmatpush.bf16.msra.mxu2 %v2489_v59 }
 0x53a   : > { %1282 = vadd.xlane.f32.xlu0 %v3196_v61 }
 0x543   : > { %v1263_v62 = vpop.f32.mrf.mxu2 }
 0x544   : > { %v1264_v63 = vadd.f32 %v2789_v52, %v1263_v62  ;;  %v2706_v62 = vld [vmem:[%s3706_s10 + $0x8c] sm:$0xf0] }
 0x546   : > { %v1274_v4 = vmul.f32 %v2790_v53, %v1264_v63  ;;  %v2704_v63 = vld [vmem:[%s3706_s10 + $0x84] sm:$0xf] }
 0x548   : > { %v3200_v5 = vadd.f32 %v1274_v4, %v3076_v0  ;;  %v2461_v4 = vor.u32 %v2706_v62, %v2460_v60  ;;  %v2398_v60 = vld [vmem:[%s3706_s10 + $0x10] sm:$0xf0]  ;;  %v2404_v62 = vld [vmem:[%s3706_s10 + $0x8] sm:$0xf] }
 0x54a   : > { %1284 = vadd.xlane.f32.xlu1 %v3200_v5  ;;  %1583 = vmatpush.bf16.msra.mxu3 %v2461_v4  ;;  %v2691_v4 = vld [vmem:[%s3706_s10 + $0x14] sm:$0xf0] }
 0x54b   : > { %v1265_v1 = vpop.f32.mrf.mxu2 }
 0x54c   : > { %v1266_v6 = vadd.f32 %v2789_v52, %v1265_v1  ;;  %v2484_v52 = vld [vmem:[%s3706_s10 + $0xa8] sm:$0xf]  ;;  %v2462_v1 = vld [vmem:[%s3706_s10 + $0x90] sm:$0xf0] }
 0x54e   : > { %v1275_v7 = vmul.f32 %v2790_v53, %v1266_v6  ;;  %v2711_v53 = vld [vmem:[%s3706_s10 + $0xb4] sm:$0xf0]  ;;  %v2468_v6 = vld [vmem:[%s3706_s10 + $0x88] sm:$0xf] }
 0x54f   : > { %v2485_v55 = vor.u32 %v2711_v53, %v2484_v52  ;;  %v2425_v53 = vor.u32 %v2693_v50, %v2422_v51 }
 0x550   : > { %v3204_v8 = vadd.f32 %v1275_v7, %v3082_v2  ;;  %v2707_v7 = vld [vmem:[%s3706_s10 + $0x94] sm:$0xf0] }
 0x551   : > { %1620 = vmatpush.bf16.msra.mxu1 %v2485_v55  ;;  %v2690_v55 = vld [vmem:[%s3706_s10 + $0xc] sm:$0xf0] }
 0x552   : > { %1286 = vadd.xlane.f32.xlu1 %v3204_v8  ;;  %v2397_v59 = vor.u32 %v2690_v55, %v2396_v54 }
 0x5a5   : > { %v1281_v3 = vpop.xlane.xlu1 %1280 }
 0x5a6   : > { %v1288_v9 = vmul.f32 %v1281_v3, %v3088_v10  ;;  %v2465_v3 = vor.u32 %v2704_v63, %v2462_v1  ;;  %v2401_v63 = vor.u32 %v2688_v56, %v2398_v60  ;;  %v2689_v1 = vld [vmem:[%s3706_s10 + $0xc] sm:$0xf] }
 0x5a8   : > { %v3209_v11 = vsub.f32 %v3192_v57, %v1288_v9  ;;  %v2469_v9 = vor.u32 %v2707_v7, %v2468_v6  ;;  %1602 = vmatpush.bf16.msra.mxu0 %v2465_v3  ;;  %v2406_v6 = vld [vmem:[%s3706_s10 + $0x18] sm:$0xf0]  ;;  %v2405_v7 = vor.u32 %v2691_v4, %v2404_v62 }
 0x5a9   : > { %v2409_v3 = vor.u32 %v2689_v1, %v2406_v6  ;;  %v2735_v4 = vld [vmem:[%s3708_s12 + $0x78] sm:$0xff]  ;;  %v2742_v1 = vld [vmem:[%s3708_s12 + $0xb0] sm:$0xff] }
 0x5aa   : > { %v1296_v0 = vmul.f32 %v3209_v11, %v3209_v11  ;;  %1621 = vmatpush.bf16.msra.mxu1 %v2469_v9  ;;  %v2727_v6 = vld [vmem:[%s3708_s12 + $0x38] sm:$0xff] }
 0x5ac   : > { %1300 = vadd.xlane.f32.xlu2 %v1296_v0  ;;  %v2705_v0 = vld [vmem:[%s3706_s10 + $0x8c] sm:$0xf] }
 0x5ad   : > { %v1283_v12 = vpop.xlane.xlu0 %1282 }
 0x5ae   : > { %v1289_v13 = vmul.f32 %v1283_v12, %v3088_v10  ;;  %v2470_v12 = vld [vmem:[%s3706_s10 + $0x98] sm:$0xf0] }
 0x5b0   : > { %v3215_v14 = vsub.f32 %v3196_v61, %v1289_v13  ;;  %v2473_v13 = vor.u32 %v2705_v0, %v2470_v12 }
 0x5b2   : > { %v1297_v2 = vmul.f32 %v3215_v14, %v3215_v14  ;;  %1640 = vmatpush.bf16.msra.mxu2 %v2473_v13 }
 0x5b4   : > { %1302 = vadd.xlane.f32.xlu1 %v1297_v2  ;;  %v2444_v2 = vld [vmem:[%s3706_s10 + $0x60] sm:$0xf] }
 0x5b6   : > { %1641 = vmatpush.bf16.msra.mxu2 %v2457_v30 }
 0x5ba   : > { %1642 = vmatpush.bf16.msra.mxu2 %v2441_v41 }
 0x5bd   : > { %v1285_v17 = vpop.xlane.xlu1 %1284 }
 0x5be   : > { %v1290_v18 = vmul.f32 %v1285_v17, %v3088_v10  ;;  %v2702_v17 = vld [vmem:[%s3706_s10 + $0x6c] sm:$0xf0]  ;;  %1643 = vmatpush.bf16.msra.mxu2 %v2425_v53 }
 0x5c0   : > { %v3221_v19 = vsub.f32 %v3200_v5, %v1290_v18  ;;  %v2700_v18 = vld [vmem:[%s3706_s10 + $0x64] sm:$0xf] }
 0x5c2   : > { %v1298_v20 = vmul.f32 %v3221_v19, %v3221_v19  ;;  %1644 = vmatpush.bf16.msra.mxu2 %v2409_v3  ;;  %v2733_v3 = vld [vmem:[%s3708_s12 + $0x68] sm:$0xff] }
 0x5c4   : > { %1304 = vadd.xlane.f32.xlu1 %v1298_v20  ;;  %v2445_v20 = vor.u32 %v2702_v17, %v2444_v2 }
 0x5c5   : > { %v1287_v21 = vpop.xlane.xlu1 %1286 }
 0x5c6   : > { %v1291_v22 = vmul.f32 %v1287_v21, %v3088_v10  ;;  %v2446_v21 = vld [vmem:[%s3706_s10 + $0x70] sm:$0xf0]  ;;  %1584 = vmatpush.bf16.msra.mxu3 %v2445_v20 }
 0x5c7   : > { %v2449_v27 = vor.u32 %v2700_v18, %v2446_v21 }
 0x5c8   : > { %v3227_v25 = vsub.f32 %v3204_v8, %v1291_v22  ;;  %v2452_v22 = vld [vmem:[%s3706_s10 + $0x68] sm:$0xf] }
 0x5c9   : > { %1603 = vmatpush.bf16.msra.mxu0 %v2449_v27 }
 0x5ca   : > { %v1299_v26 = vmul.f32 %v3227_v25, %v3227_v25  ;;  %1585 = vmatpush.bf16.msra.mxu3 %v2429_v34  ;;  %v2791_v34 = vld [vmem:[%s3704_s8] ss:$0 sm:$0xff] }
 0x5cc   : > { %1306 = vadd.xlane.f32.xlu1 %v1299_v26  ;;  %v2703_v26 = vld [vmem:[%s3706_s10 + $0x74] sm:$0xf0] }
 0x5cd   : > { %v2453_v28 = vor.u32 %v2703_v26, %v2452_v22  ;;  %1604 = vmatpush.bf16.msra.mxu0 %v2433_v37 }
 0x5ce   : > { %1586 = vmatpush.bf16.msra.mxu3 %v2413_v45 }
 0x5cf   : > { %1622 = vmatpush.bf16.msra.mxu1 %v2453_v28 }
 0x5d1   : > { %1605 = vmatpush.bf16.msra.mxu0 %v2417_v49 }
 0x5d2   : > { %1587 = vmatpush.bf16.msra.mxu3 %v2397_v59 }
 0x5d3   : > { %1623 = vmatpush.bf16.msra.mxu1 %v2437_v38  ;;  %v2792_v38 = vld [vmem:[%s3705_s9] ss:$0 sm:$0xff] }
 0x5d5   : > { %1606 = vmatpush.bf16.msra.mxu0 %v2401_v63 }
 0x5d6   : > { %2068 = vmatpush.bf16.msrb.mxu3 %v2727_v6 }
 0x5d7   : > { %1624 = vmatpush.bf16.msra.mxu1 %v2421_v15 }
 0x5d9   : > { %2087 = vmatpush.bf16.msrb.mxu0 %v2735_v4 }
 0x5db   : > { %1625 = vmatpush.bf16.msra.mxu1 %v2405_v7  ;;  %v2751_v7 = vld [vmem:[%s3708_s12 + $0xf8] sm:$0xff] }
 0x5dc   : > { %2125 = vmatpush.bf16.msrb.mxu2 %v2751_v7 }
 0x61f   : > { %v1301_v23 = vpop.xlane.xlu2 %1300 }
 0x620   : > { %v1308_v52 = vmul.f32 %v1301_v23, %v3088_v10 }
 0x622   : > { %v1312_v58 = vadd.f32 1e-06, %v1308_v52 }
 0x624   : > { %2837 = vrsqrt.f32 %v1312_v58  ;;  %vm1322_vm3 = vweird.f32 %v1312_v58 }
 0x627   : > { %v1303_v9 = vpop.xlane.xlu1 %1302 }
 0x628   : > { %v1309_v0 = vmul.f32 %v1303_v9, %v3088_v10  ;;  %v2741_v9 = vld [vmem:[%s3708_s12 + $0xa8] sm:$0xff] }
 0x62a   : > { %v2838_v12 = vpop.eup %2837  ;;  %v1313_v13 = vadd.f32 1e-06, %v1309_v0  ;;  %v2726_v0 = vld [vmem:[%s3708_s12 + $0x30] sm:$0xff] }
 0x62b   : > { %v1317_v2 = vmul.f32 %v2838_v12, %v1312_v58  ;;  %vm1323_vm2 = vweird.f32 %v2838_v12  ;;  %2069 = vmatpush.bf16.msrb.mxu3 %v2726_v0 }
 0x62c   : > { %2839 = vrsqrt.f32 %v1313_v13  ;;  %vm1324_vm4 = vmor %vm1322_vm3, %vm1323_vm2  ;;  %vm1332_vm6 = vweird.f32 %v1313_v13 }
 0x62d   : > { %v1318_v17 = vmul.f32 %v2838_v12, %v1317_v2  ;;  %v2740_v2 = vld [vmem:[%s3708_s12 + $0xa0] sm:$0xff] }
 0x62f   : > { %v1319_v18 = vmul.f32 0.5, %v1318_v17  ;;  %v2725_v17 = vld [vmem:[%s3708_s12 + $0x28] sm:$0xff] }
 0x630   : > { %2070 = vmatpush.bf16.msrb.mxu3 %v2725_v17 }
 0x631   : > { %v1320_v20 = vsub.f32 1.5, %v1319_v18  ;;  %v2749_v18 = vld [vmem:[%s3708_s12 + $0xe8] sm:$0xff] }
 0x632   : > { %v2840_v21 = vpop.eup %2839 }
 0x633   : > { %v1321_v22 = vmul.f32 %v2838_v12, %v1320_v20  ;;  %v1327_v26 = vmul.f32 %v2840_v21, %v1313_v13  ;;  %vm1333_vm5 = vweird.f32 %v2840_v21  ;;  %v2732_v13 = vld [vmem:[%s3708_s12 + $0x60] sm:$0xff]  ;;  %v2731_v20 = vld [vmem:[%s3708_s12 + $0x58] sm:$0xff] }
 0x634   : > { %vm1334_vm7 = vmor %vm1332_vm6, %vm1333_vm5 }
 0x635   : > { %v1328_v27 = vmul.f32 %v2840_v21, %v1327_v26  ;;  %v1325_v28 = vsel %vm1324_vm4, %v2838_v12, %v1321_v22  ;;  %v2750_v12 = vld [vmem:[%s3708_s12 + $0xf0] sm:$0xff]  ;;  %v2724_v22 = vld [vmem:[%s3708_s12 + $0x20] sm:$0xff] }
 0x636   : > { %v1356_v32 = vmul.f32 %v1325_v28, %v3209_v11  ;;  %2126 = vmatpush.bf16.msrb.mxu2 %v2750_v12  ;;  %v2748_v26 = vld [vmem:[%s3708_s12 + $0xe0] sm:$0xff]  ;;  %2071 = vmatpush.bf16.msrb.mxu3 %v2724_v22  ;;  %v2738_v28 = vld [vmem:[%s3708_s12 + $0x90] sm:$0xff] }
 0x637   : > { %v1329_v29 = vmul.f32 0.5, %v1328_v27  ;;  %v1305_v16 = vpop.xlane.xlu1 %1304  ;;  %v2730_v27 = vld [vmem:[%s3708_s12 + $0x50] sm:$0xff] }
 0x638   : > { %v1310_v30 = vmul.f32 %v1305_v16, %v3088_v10  ;;  %v1364_v37 = vmul.f32 %v2791_v34, %v1356_v32  ;;  %v2723_v16 = vld [vmem:[%s3708_s12 + $0x18] sm:$0xff]  ;;  %v2737_v32 = vld [vmem:[%s3708_s12 + $0x88] sm:$0xff] }
 0x639   : > { %v1330_v31 = vsub.f32 1.5, %v1329_v29  ;;  %v1410_v29 = vld [vmem:[%s3707_s11] sm:$0xf] }
 0x63a   : > { %v1314_v33 = vadd.f32 1e-06, %v1310_v30  ;;  %v1372_v43 = vadd.f32 %v2792_v38, %v1364_v37  ;;  %2127 = vmatpush.bf16.msrb.mxu2 %v2749_v18  ;;  %v2747_v30 = vld [vmem:[%s3708_s12 + $0xd8] sm:$0xff]  ;;  %2072 = vmatpush.bf16.msrb.mxu3 %v2723_v16  ;;  %v2728_v37 = vld [vmem:[%s3708_s12 + $0x40] sm:$0xff] }
 0x63b   : > { %v1331_v35 = vmul.f32 %v2840_v21, %v1330_v31  ;;  %v2729_v31 = vld [vmem:[%s3708_s12 + $0x48] sm:$0xff] }
 0x63c   : > { %2841 = vrsqrt.f32 %v1314_v33  ;;  %vm1342_vm9 = vweird.f32 %v1314_v33 }
 0x63d   : > { %v1335_v24 = vsel %vm1334_vm7, %v2840_v21, %v1331_v35  ;;  %v2739_v21 = vld [vmem:[%s3708_s12 + $0x98] sm:$0xff]  ;;  %v2722_v35 = vld [vmem:[%s3708_s12 + $0x10] sm:$0xff] }
 0x63e   : > { %v1357_v36 = vmul.f32 %v1335_v24, %v3215_v14  ;;  %2128 = vmatpush.bf16.msrb.mxu2 %v2748_v26  ;;  %v2746_v24 = vld [vmem:[%s3708_s12 + $0xd0] sm:$0xff]  ;;  %2073 = vmatpush.bf16.msrb.mxu3 %v2722_v35 }
 0x63f   : > { %v1307_v39 = vpop.xlane.xlu1 %1306 }
 0x640   : > { %v1311_v11 = vmul.f32 %v1307_v39, %v3088_v10  ;;  %v1365_v40 = vmul.f32 %v2791_v34, %v1357_v36 }
 0x642   : > { %v2842_v41 = vpop.eup %2841  ;;  %v1315_v42 = vadd.f32 1e-06, %v1311_v11  ;;  %v1373_v44 = vadd.f32 %v2792_v38, %v1365_v40  ;;  %2129 = vmatpush.bf16.msrb.mxu2 %v2747_v30 }
 0x643   : > { %v1337_v45 = vmul.f32 %v2842_v41, %v1314_v33  ;;  %vm1343_vm8 = vweird.f32 %v2842_v41  ;;  %v3512_v33 = vperm.slane %v1410_v29, 1 }
 0x644   : > { %2843 = vrsqrt.f32 %v1315_v42  ;;  %v1376_v46 = vpack.c.bf16 %v1373_v44, %v1372_v43  ;;  %vm1344_vm10 = vmor %vm1342_vm9, %vm1343_vm8  ;;  %vm1352_vm12 = vweird.f32 %v1315_v42  ;;  %v3542_v44 = vperm.slane %v1410_v29, 0 }
 0x645   : > { %v1338_v47 = vmul.f32 %v2842_v41, %v1337_v45 }
 0x646   : > { %1588 = vmatmul.bf16.vlgmr.msra.gmra.mxu3 %v1376_v46  ;;  %1607 = vmatmul.bf16.vlgmr.msra.gmra.mxu0 %v1376_v46 }
 0x647   : > { %v1339_v14 = vmul.f32 0.5, %v1338_v47  ;;  %1626 = vmatmul.bf16.vlgmr.msra.gmra.mxu1 %v1376_v46  ;;  %1645 = vmatmul.bf16.vlgmr.msra.gmra.mxu2 %v1376_v46  ;;  %v3546_v46 = vperm.slane %v1410_v29, 3 }
 0x648   : > { %2130 = vmatpush.bf16.msrb.mxu2 %v2746_v24 }
 0x649   : > { %v1340_v48 = vsub.f32 1.5, %v1339_v14 }
 0x64a   : > { %v2844_v23 = vpop.eup %2843 }
 0x64b   : > { %v1341_v49 = vmul.f32 %v2842_v41, %v1340_v48  ;;  %v1347_v15 = vmul.f32 %v2844_v23, %v1315_v42  ;;  %vm1353_vm11 = vweird.f32 %v2844_v23  ;;  %v2745_v42 = vld [vmem:[%s3708_s12 + $0xc8] sm:$0xff] }
 0x64c   : > { %vm1354_vm13 = vmor %vm1352_vm12, %vm1353_vm11  ;;  %2131 = vmatpush.bf16.msrb.mxu2 %v2745_v42 }
 0x64d   : > { %v1348_v10 = vmul.f32 %v2844_v23, %v1347_v15  ;;  %v1345_v50 = vsel %vm1344_vm10, %v2842_v41, %v1341_v49  ;;  %v2721_v41 = vld [vmem:[%s3708_s12 + $0x8] sm:$0xff] }
 0x64e   : > { %v1358_v53 = vmul.f32 %v1345_v50, %v3221_v19  ;;  %v2743_v19 = vld [vmem:[%s3708_s12 + $0xb8] sm:$0xff]  ;;  %2074 = vmatpush.bf16.msrb.mxu3 %v2721_v41  ;;  %v2744_v50 = vld [vmem:[%s3708_s12 + $0xc0] sm:$0xff] }
 0x64f   : > { %v1349_v51 = vmul.f32 0.5, %v1348_v10  ;;  %2106 = vmatpush.bf16.msrb.mxu1 %v2743_v19  ;;  %v2720_v10 = vld [vmem:[%s3708_s12] sm:$0xff] }
 0x650   : > { %v1366_v58 = vmul.f32 %v2791_v34, %v1358_v53  ;;  %2132 = vmatpush.bf16.msrb.mxu2 %v2744_v50 }
 0x651   : > { %v1350_v52 = vsub.f32 1.5, %v1349_v51 }
 0x652   : > { %v1374_v60 = vadd.f32 %v2792_v38, %v1366_v58  ;;  %2075 = vmatpush.bf16.msrb.mxu3 %v2720_v10 }
 0x653   : > { %v1351_v54 = vmul.f32 %v2844_v23, %v1350_v52  ;;  %2107 = vmatpush.bf16.msrb.mxu1 %v2742_v1 }
 0x655   : > { %v1355_v55 = vsel %vm1354_vm13, %v2844_v23, %v1351_v54 }
 0x656   : > { %v1359_v56 = vmul.f32 %v1355_v55, %v3227_v25  ;;  %v2734_v25 = vld [vmem:[%s3708_s12 + $0x70] sm:$0xff] }
 0x657   : > { %2088 = vmatpush.bf16.msrb.mxu0 %v2734_v25  ;;  %2108 = vmatpush.bf16.msrb.mxu1 %v2741_v9 }
 0x658   : > { %v1367_v59 = vmul.f32 %v2791_v34, %v1359_v56  ;;  %v3514_v34 = vperm.slane %v1410_v29, 2 }
 0x65a   : > { %v1375_v62 = vadd.f32 %v2792_v38, %v1367_v59  ;;  %v2736_v38 = vld [vmem:[%s3708_s12 + $0x80] sm:$0xff] }
 0x65b   : > { %2089 = vmatpush.bf16.msrb.mxu0 %v2733_v3  ;;  %2109 = vmatpush.bf16.msrb.mxu1 %v2740_v2 }
 0x65c   : > { %v1377_v63 = vpack.c.bf16 %v1375_v62, %v1374_v60 }
 0x65e   : > { %1593 = vmatmul.bf16.gmra.mxu3 %v1377_v63  ;;  %1612 = vmatmul.bf16.gmra.mxu0 %v1377_v63 }
 0x65f   : > { %1631 = vmatmul.bf16.gmra.mxu1 %v1377_v63  ;;  %1650 = vmatmul.bf16.gmra.mxu2 %v1377_v63 }
 0x660   : > { %2090 = vmatpush.bf16.msrb.mxu0 %v2732_v13  ;;  %2110 = vmatpush.bf16.msrb.mxu1 %v2739_v21 }
 0x664   : > { %2091 = vmatpush.bf16.msrb.mxu0 %v2731_v20  ;;  %2111 = vmatpush.bf16.msrb.mxu1 %v2738_v28 }
 0x668   : > { %2092 = vmatpush.bf16.msrb.mxu0 %v2730_v27  ;;  %2112 = vmatpush.bf16.msrb.mxu1 %v2737_v32 }
 0x66c   : > { %2093 = vmatpush.bf16.msrb.mxu0 %v2729_v31  ;;  %2113 = vmatpush.bf16.msrb.mxu1 %v2736_v38 }
 0x670   : > { %2094 = vmatpush.bf16.msrb.mxu0 %v2728_v37 }
 0x6c3   : > { %v1608_v36 = vpop.f32.mrf.mxu0 }
 0x6c4   : > { %v3529_v39 = vadd.f32 %v1608_v36, %v3512_v33  ;;  %v1627_v11 = vpop.f32.mrf.mxu1 }
 0x6c5   : > { %v3532_v40 = vadd.f32 %v1627_v11, %v3514_v34 }
 0x6c6   : > { %v1657_v43 = vmul.f32 %v3529_v39, %v3529_v39 }
 0x6c7   : > { %v1658_v45 = vmul.f32 %v3532_v40, %v3532_v40 }
 0x6c8   : > { %v1673_v47 = vmul.f32 %v1657_v43, %v3529_v39 }
 0x6c9   : > { %v1674_v14 = vmul.f32 %v1658_v45, %v3532_v40  ;;  %v1589_v48 = vpop.f32.mrf.mxu3 }
 0x6ca   : > { %v1689_v23 = vmul.f32 0.044715, %v1673_v47  ;;  %v3551_v49 = vadd.f32 %v1589_v48, %v3542_v44  ;;  %v1646_v15 = vpop.f32.mrf.mxu2 }
 0x6cb   : > { %v1690_v51 = vmul.f32 0.044715, %v1674_v14  ;;  %v3560_v52 = vadd.f32 %v1646_v15, %v3546_v46  ;;  %v1610_v53 = vpop.f32.mrf.mxu0 }
 0x6cc   : > { %v1705_v54 = vadd.f32 %v1689_v23, %v3529_v39  ;;  %v1656_v55 = vmul.f32 %v3551_v49, %v3551_v49  ;;  %v3566_v56 = vadd.f32 %v1610_v53, %v3512_v33  ;;  %v1629_v58 = vpop.f32.mrf.mxu1 }
 0x6cd   : > { %v1706_v59 = vadd.f32 %v1690_v51, %v3532_v40  ;;  %v1659_v60 = vmul.f32 %v3560_v52, %v3560_v52  ;;  %v3572_v62 = vadd.f32 %v1629_v58, %v3514_v34 }
 0x6ce   : > { %v1721_v63 = vmul.f32 0.7978846, %v1705_v54  ;;  %v1672_v4 = vmul.f32 %v1656_v55, %v3551_v49  ;;  %v1661_v19 = vmul.f32 %v3566_v56, %v3566_v56 }
 0x6cf   : > { %v1722_v25 = vmul.f32 0.7978846, %v1706_v59  ;;  %v1675_v1 = vmul.f32 %v1659_v60, %v3560_v52  ;;  %v1662_v6 = vmul.f32 %v3572_v62, %v3572_v62 }
 0x6d0   : > { %2845 = vtanh.f32 %v1721_v63  ;;  %v1688_v7 = vmul.f32 0.044715, %v1672_v4  ;;  %v1677_v3 = vmul.f32 %v1661_v19, %v3566_v56 }
 0x6d1   : > { %2847 = vtanh.f32 %v1722_v25  ;;  %v1691_v9 = vmul.f32 0.044715, %v1675_v1  ;;  %v1678_v0 = vmul.f32 %v1662_v6, %v3572_v62  ;;  %v1591_v12 = vpop.f32.mrf.mxu3 }
 0x6d2   : > { %v1704_v13 = vadd.f32 %v1688_v7, %v3551_v49  ;;  %v1693_v2 = vmul.f32 0.044715, %v1677_v3  ;;  %v3584_v17 = vadd.f32 %v1591_v12, %v3542_v44  ;;  %v1648_v18 = vpop.f32.mrf.mxu2 }
 0x6d3   : > { %v1707_v20 = vadd.f32 %v1691_v9, %v3560_v52  ;;  %v1694_v21 = vmul.f32 0.044715, %v1678_v0  ;;  %v3588_v22 = vadd.f32 %v1648_v18, %v3546_v46 }
 0x6d4   : > { %v1720_v26 = vmul.f32 0.7978846, %v1704_v13  ;;  %v1709_v27 = vadd.f32 %v1693_v2, %v3566_v56  ;;  %v1660_v28 = vmul.f32 %v3584_v17, %v3584_v17 }
 0x6d5   : > { %v1723_v29 = vmul.f32 0.7978846, %v1707_v20  ;;  %v1710_v16 = vadd.f32 %v1694_v21, %v3572_v62  ;;  %v1663_v30 = vmul.f32 %v3588_v22, %v3588_v22 }
 0x6d6   : > { %v2846_v31 = vpop.eup %2845  ;;  %2849 = vtanh.f32 %v1720_v26  ;;  %v1725_v32 = vmul.f32 0.7978846, %v1709_v27  ;;  %v1676_v35 = vmul.f32 %v1660_v28, %v3584_v17 }
 0x6d7   : > { %v2848_v24 = vpop.eup %2847  ;;  %2851 = vtanh.f32 %v1723_v29  ;;  %v1726_v36 = vmul.f32 0.7978846, %v1710_v16  ;;  %v1679_v37 = vmul.f32 %v1663_v30, %v3588_v22  ;;  %v1753_v38 = vadd.f32 1.0, %v2846_v31 }
 0x6d8   : > { %2853 = vtanh.f32 %v1725_v32  ;;  %v1692_v11 = vmul.f32 0.044715, %v1676_v35  ;;  %v1754_v41 = vadd.f32 1.0, %v2848_v24 }
 0x6d9   : > { %2855 = vtanh.f32 %v1726_v36  ;;  %v1695_v42 = vmul.f32 0.044715, %v1679_v37  ;;  %v1769_v48 = vmul.f32 0.5, %v1753_v38 }
 0x6da   : > { %v1708_v43 = vadd.f32 %v1692_v11, %v3584_v17  ;;  %v1770_v51 = vmul.f32 0.5, %v1754_v41 }
 0x6db   : > { %v1711_v45 = vadd.f32 %v1695_v42, %v3588_v22  ;;  %v1613_v47 = vpop.f32.mrf.mxu0  ;;  %v1785_v3 = vmul.f32 %v1769_v48, %v3529_v39 }
 0x6dc   : > { %v2850_v14 = vpop.eup %2849  ;;  %v1724_v23 = vmul.f32 0.7978846, %v1708_v43  ;;  %v3601_v15 = vadd.f32 %v1613_v47, %v3512_v33  ;;  %v1632_v10 = vpop.f32.mrf.mxu1  ;;  %v1786_v9 = vmul.f32 %v1770_v51, %v3532_v40 }
 0x6dd   : > { %v2852_v50 = vpop.eup %2851  ;;  %v1752_v53 = vadd.f32 1.0, %v2850_v14  ;;  %v1727_v54 = vmul.f32 0.7978846, %v1711_v45  ;;  %v3604_v55 = vadd.f32 %v1632_v10, %v3514_v34 }
 0x6de   : > { %v2854_v58 = vpop.eup %2853  ;;  %v1755_v59 = vadd.f32 1.0, %v2852_v50  ;;  %2857 = vtanh.f32 %v1724_v23  ;;  %v1665_v60 = vmul.f32 %v3601_v15, %v3601_v15 }
 0x6df   : > { %v2856_v63 = vpop.eup %2855  ;;  %v1768_v4 = vmul.f32 0.5, %v1752_v53  ;;  %v1757_v19 = vadd.f32 1.0, %v2854_v58  ;;  %2859 = vtanh.f32 %v1727_v54  ;;  %v1666_v25 = vmul.f32 %v3604_v55, %v3604_v55 }
 0x6e0   : > { %v1771_v1 = vmul.f32 0.5, %v1755_v59  ;;  %v1758_v6 = vadd.f32 1.0, %v2856_v63  ;;  %v1681_v7 = vmul.f32 %v1665_v60, %v3601_v15 }
 0x6e1   : > { %v1773_v0 = vmul.f32 0.5, %v1757_v19  ;;  %v1682_v12 = vmul.f32 %v1666_v25, %v3604_v55  ;;  %v1594_v13 = vpop.f32.mrf.mxu3  ;;  %v1784_v2 = vmul.f32 %v1768_v4, %v3551_v49 }
 0x6e2   : > { %v1774_v18 = vmul.f32 0.5, %v1758_v6  ;;  %v1697_v20 = vmul.f32 0.044715, %v1681_v7  ;;  %v3616_v21 = vadd.f32 %v1594_v13, %v3542_v44  ;;  %v1651_v26 = vpop.f32.mrf.mxu2  ;;  %v1787_v27 = vmul.f32 %v1771_v1, %v3560_v52 }
 0x6e3   : > { %v1789_v28 = vmul.f32 %v1773_v0, %v3566_v56  ;;  %v1698_v29 = vmul.f32 0.044715, %v1682_v12  ;;  %v3621_v39 = vadd.f32 %v1651_v26, %v3546_v46  ;;  %v1615_v40 = vpop.f32.mrf.mxu0 }
 0x6e4   : > { %v2858_v16 = vpop.eup %2857  ;;  %v1790_v30 = vmul.f32 %v1774_v18, %v3572_v62  ;;  %v1713_v49 = vadd.f32 %v1697_v20, %v3601_v15  ;;  %v1664_v31 = vmul.f32 %v3616_v21, %v3616_v21  ;;  %v3628_v32 = vadd.f32 %v1615_v40, %v3512_v33  ;;  %v1634_v35 = vpop.f32.mrf.mxu1 }
 0x6e5   : > { %v2860_v52 = vpop.eup %2859  ;;  %v1756_v24 = vadd.f32 1.0, %v2858_v16  ;;  %v1714_v56 = vadd.f32 %v1698_v29, %v3604_v55  ;;  %v1667_v36 = vmul.f32 %v3621_v39, %v3621_v39  ;;  %v3634_v37 = vadd.f32 %v1634_v35, %v3514_v34 }
 0x6e6   : > { %v1759_v62 = vadd.f32 1.0, %v2860_v52  ;;  %v1680_v38 = vmul.f32 %v1664_v31, %v3616_v21  ;;  %v1669_v11 = vmul.f32 %v3628_v32, %v3628_v32  ;;  %v1801_v41 = vpack.c.bf16 %v1789_v28, %v1785_v3 }
 0x6e7   : > { %v1772_v33 = vmul.f32 0.5, %v1756_v24  ;;  %v1683_v42 = vmul.f32 %v1667_v36, %v3621_v39  ;;  %v1670_v43 = vmul.f32 %v3634_v37, %v3634_v37  ;;  %v1802_v45 = vpack.c.bf16 %v1790_v30, %v1786_v9 }
 0x6e8   : > { %v1775_v47 = vmul.f32 0.5, %v1759_v62  ;;  %v1696_v14 = vmul.f32 0.044715, %v1680_v38  ;;  %v1685_v48 = vmul.f32 %v1669_v11, %v3628_v32  ;;  %2095 = vmatmul.bf16.vlgmr.msrb.gmra.mxu0 %v1801_v41  ;;  %v1729_v34 = vmul.f32 0.7978846, %v1713_v49 }
 0x6e9   : > { %v1788_v23 = vmul.f32 %v1772_v33, %v3584_v17  ;;  %v1699_v10 = vmul.f32 0.044715, %v1683_v42  ;;  %v1686_v50 = vmul.f32 %v1670_v43, %v3634_v37  ;;  %2114 = vmatmul.bf16.vlgmr.msrb.gmra.mxu1 %v1802_v45  ;;  %v1596_v51 = vpop.f32.mrf.mxu3  ;;  %v1730_v53 = vmul.f32 0.7978846, %v1714_v56 }
 0x6ea   : > { %v1791_v54 = vmul.f32 %v1775_v47, %v3588_v22  ;;  %v1712_v58 = vadd.f32 %v1696_v14, %v3616_v21  ;;  %v1701_v59 = vmul.f32 0.044715, %v1685_v48  ;;  %v3648_v60 = vadd.f32 %v1596_v51, %v3542_v44  ;;  %v1653_v63 = vpop.f32.mrf.mxu2 }
 0x6eb   : > { %v1715_v4 = vadd.f32 %v1699_v10, %v3621_v39  ;;  %v1702_v19 = vmul.f32 0.044715, %v1686_v50  ;;  %v3652_v17 = vadd.f32 %v1653_v63, %v3546_v46  ;;  %v1800_v25 = vpack.c.bf16 %v1788_v23, %v1784_v2 }
 0x6ec   : > { %v1717_v1 = vadd.f32 %v1701_v59, %v3628_v32  ;;  %v1668_v6 = vmul.f32 %v3648_v60, %v3648_v60  ;;  %v1803_v22 = vpack.c.bf16 %v1791_v54, %v1787_v27  ;;  %2861 = vtanh.f32 %v1729_v34 }
 0x6ed   : > { %v1718_v7 = vadd.f32 %v1702_v19, %v3634_v37  ;;  %v1671_v44 = vmul.f32 %v3652_v17, %v3652_v17  ;;  %2076 = vmatmul.bf16.vlgmr.msrb.gmra.mxu3 %v1800_v25  ;;  %2863 = vtanh.f32 %v1730_v53  ;;  %v1728_v3 = vmul.f32 0.7978846, %v1712_v58 }
 0x6ee   : > { %v1684_v9 = vmul.f32 %v1668_v6, %v3648_v60  ;;  %2133 = vmatmul.bf16.vlgmr.msrb.gmra.mxu2 %v1803_v22  ;;  %v1733_v46 = vmul.f32 0.7978846, %v1717_v1  ;;  %v1731_v0 = vmul.f32 0.7978846, %v1715_v4  ;;  %v2793_v4 = vld [vmem:[%s3709_s13] ss:$0 sm:$0xff] }
 0x6ef   : > { %v1687_v12 = vmul.f32 %v1671_v44, %v3652_v17  ;;  %v1734_v13 = vmul.f32 0.7978846, %v1718_v7  ;;  %2865 = vtanh.f32 %v1728_v3 }
 0x6f0   : > { %v1700_v2 = vmul.f32 0.044715, %v1684_v9  ;;  %2867 = vtanh.f32 %v1733_v46 }
 0x6f1   : > { %v1703_v18 = vmul.f32 0.044715, %v1687_v12  ;;  %2869 = vtanh.f32 %v1734_v13 }
 0x6f2   : > { %v2862_v20 = vpop.eup %2861  ;;  %v1716_v26 = vadd.f32 %v1700_v2, %v3648_v60  ;;  %2871 = vtanh.f32 %v1731_v0 }
 0x6f3   : > { %v2864_v27 = vpop.eup %2863  ;;  %v1719_v28 = vadd.f32 %v1703_v18, %v3652_v17  ;;  %v1761_v29 = vadd.f32 1.0, %v2862_v20 }
 0x6f4   : > { %v1762_v40 = vadd.f32 1.0, %v2864_v27  ;;  %v1732_v16 = vmul.f32 0.7978846, %v1716_v26 }
 0x6f5   : > { %v2866_v30 = vpop.eup %2865  ;;  %v1735_v49 = vmul.f32 0.7978846, %v1719_v28  ;;  %v1777_v24 = vmul.f32 0.5, %v1761_v29 }
 0x6f6   : > { %v2868_v31 = vpop.eup %2867  ;;  %2873 = vtanh.f32 %v1732_v16  ;;  %v1778_v62 = vmul.f32 0.5, %v1762_v40  ;;  %v1760_v11 = vadd.f32 1.0, %v2866_v30 }
 0x6f7   : > { %v2870_v35 = vpop.eup %2869  ;;  %v1765_v52 = vadd.f32 1.0, %v2868_v31  ;;  %2875 = vtanh.f32 %v1735_v49  ;;  %v1793_v42 = vmul.f32 %v1777_v24, %v3601_v15 }
 0x6f8   : > { %v2872_v56 = vpop.eup %2871  ;;  %v1766_v36 = vadd.f32 1.0, %v2870_v35  ;;  %v1794_v47 = vmul.f32 %v1778_v62, %v3604_v55  ;;  %v1776_v10 = vmul.f32 0.5, %v1760_v11 }
 0x6f9   : > { %v1781_v38 = vmul.f32 0.5, %v1765_v52  ;;  %v1763_v33 = vadd.f32 1.0, %v2872_v56 }
 0x6fa   : > { %v1782_v41 = vmul.f32 0.5, %v1766_v36  ;;  %v1792_v15 = vmul.f32 %v1776_v10, %v3616_v21 }
 0x6fb   : > { %v1797_v43 = vmul.f32 %v1781_v38, %v3628_v32  ;;  %v1779_v53 = vmul.f32 0.5, %v1763_v33 }
 0x6fc   : > { %v2874_v45 = vpop.eup %2873  ;;  %v1798_v14 = vmul.f32 %v1782_v41, %v3634_v37 }
 0x6fd   : > { %v2876_v48 = vpop.eup %2875  ;;  %v1805_v34 = vpack.c.bf16 %v1797_v43, %v1793_v42  ;;  %v1764_v23 = vadd.f32 1.0, %v2874_v45  ;;  %v1795_v59 = vmul.f32 %v1779_v53, %v3621_v39  ;;  %v2794_v39 = vld [vmem:[%s3710_s14] ss:$0 sm:$0xff] }
 0x6fe   : > { %v1806_v50 = vpack.c.bf16 %v1798_v14, %v1794_v47  ;;  %v1767_v51 = vadd.f32 1.0, %v2876_v48 }
 0x6ff   : > { %2100 = vmatmul.bf16.gmra.mxu0 %v1805_v34  ;;  %v1780_v54 = vmul.f32 0.5, %v1764_v23 }
 0x700   : > { %2119 = vmatmul.bf16.gmra.mxu1 %v1806_v50  ;;  %v1783_v58 = vmul.f32 0.5, %v1767_v51 }
 0x701   : > { %v1796_v32 = vmul.f32 %v1780_v54, %v3648_v60 }
 0x702   : > { %v1799_v55 = vmul.f32 %v1783_v58, %v3652_v17 }
 0x703   : > { %v1804_v37 = vpack.c.bf16 %v1796_v32, %v1792_v15 }
 0x704   : > { %v1807_v63 = vpack.c.bf16 %v1799_v55, %v1795_v59 }
 0x705   : > { %2081 = vmatmul.bf16.gmra.mxu3 %v1804_v37 }
 0x706   : > { %2138 = vmatmul.bf16.gmra.mxu2 %v1807_v63 }
 0x765   : > { %v2096_v19 = vpop.f32.mrf.mxu0 }
 0x766   : > { %v2115_v6 = vpop.f32.mrf.mxu1 }
 0x76d   : > { %v2098_v9 = vpop.f32.mrf.mxu0 }
 0x76e   : > { %v2117_v12 = vpop.f32.mrf.mxu1 }
 0x770   : > { %v2077_v25 = vpop.f32.mrf.mxu3 }
 0x771   : > { %v2078_v1 = vadd.f32 %v2793_v4, %v2077_v25  ;;  %v2134_v22 = vpop.f32.mrf.mxu2 }
 0x773   : > { %v2097_v21 = vadd.f32 %v2096_v19, %v2078_v1 }
 0x775   : > { %v2116_v60 = vadd.f32 %v2115_v6, %v2097_v21 }
 0x777   : > { %v2135_v17 = vadd.f32 %v2134_v22, %v2116_v60 }
 0x778   : > { %v2079_v7 = vpop.f32.mrf.mxu3 }
 0x779   : > { %v2148_v44 = vmul.f32 %v2794_v39, %v2135_v17  ;;  %v2080_v3 = vadd.f32 %v2793_v4, %v2079_v7  ;;  %v2136_v2 = vpop.f32.mrf.mxu2 }
 0x77b   : > { %v2152_v46 = vadd.f32 %v2148_v44, %v3192_v57  ;;  %v2099_v0 = vadd.f32 %v2098_v9, %v2080_v3 }
 0x77c   : > { %v2101_v27 = vpop.f32.mrf.mxu0 }
 0x77d   : > { %2156 = vst [vmem:[%s3683_s23] sm:$0xff] %v2152_v46  ;;  %v2118_v13 = vadd.f32 %v2117_v12, %v2099_v0  ;;  %v2120_v40 = vpop.f32.mrf.mxu1 }
 0x77f   : > { %v2137_v18 = vadd.f32 %v2136_v2, %v2118_v13 }
 0x781   : > { %v2149_v20 = vmul.f32 %v2794_v39, %v2137_v18 }
 0x783   : > { %v2153_v26 = vadd.f32 %v2149_v20, %v3196_v61 }
 0x784   : > { %v2103_v24 = vpop.f32.mrf.mxu0 }
 0x785   : > { %2157 = vst [vmem:[%s3683_s23 + $0x8] sm:$0xff] %v2153_v26  ;;  %v2122_v62 = vpop.f32.mrf.mxu1 }
 0x788   : > { %v2082_v28 = vpop.f32.mrf.mxu3 }
 0x789   : > { %v2083_v29 = vadd.f32 %v2793_v4, %v2082_v28  ;;  %v2139_v30 = vpop.f32.mrf.mxu2 }
 0x78b   : > { %v2102_v16 = vadd.f32 %v2101_v27, %v2083_v29 }
 0x78d   : > { %v2121_v49 = vadd.f32 %v2120_v40, %v2102_v16 }
 0x78f   : > { %v2140_v57 = vadd.f32 %v2139_v30, %v2121_v49 }
 0x790   : > { %v2084_v31 = vpop.f32.mrf.mxu3 }
 0x791   : > { %v2150_v35 = vmul.f32 %v2794_v39, %v2140_v57  ;;  %v2085_v52 = vadd.f32 %v2793_v4, %v2084_v31  ;;  %v2141_v38 = vpop.f32.mrf.mxu2 }
 0x793   : > { %v2154_v56 = vadd.f32 %v2150_v35, %v3200_v5  ;;  %v2104_v36 = vadd.f32 %v2103_v24, %v2085_v52 }
 0x795   : > { %2158 = vst [vmem:[%s3683_s23 + $0x10] sm:$0xff] %v2154_v56  ;;  %v2123_v61 = vadd.f32 %v2122_v62, %v2104_v36 }
 0x797   : > { %v2142_v11 = vadd.f32 %v2141_v38, %v2123_v61 }
 0x799   : > { %v2151_v41 = vmul.f32 %v2794_v39, %v2142_v11 }
 0x79b   : > { %v2155_v33 = vadd.f32 %v2151_v41, %v3204_v8 }
 0x79d   : > { %2159 = vst [vmem:[%s3683_s23 + $0x18] sm:$0xff] %v2155_v33 }
 0x79e PF: > { %s27_s18 = sadd.s32 1, %s2951_s18  }
 0x79f   : > { %p24_p7 = scmp.ge.s32.totalorder %s27_s18, 4  }
 0x7a1   :  { %26 = sbr.rel (!%p24_p7) target bundleno = 2 (0x2), region = 119 }
 0x7a6   :  { %2181 = vsyncpa [#allocation4], 1 }
 0x7a7   :  { %2183 = vsyncpa [#allocation4 + $0x1], 1 }
 0x7a8   :  { %2184 = vsyncpa [#allocation6], 1 }

</bundles_post_ra>
